<compile_context>
chip_gen: v7x
topology: tpu7x:2x2x1
jax: 0.10.0
libtpu: 0.0.40
codegen_flags: <defaults>
</compile_context>

<pallas_src>
import jax
import jax.numpy as jnp
from jax import lax
from jax.experimental import pallas as pl
from jax.experimental.pallas import tpu as pltpu

CIN = 16
COUT = 33
COUT_PAD = 128          # lane-dense output width
K = 3
STRIDE = 2
N_CONVS = 4


def model_forward(x_nchw, weights_oihw, biases):
    """x_nchw: (N, CIN, H, W) f32.
    weights_oihw: (4, COUT, CIN, K, K) (PyTorch OIHW), biases: (4, COUT)."""
    n, cin, h, w = x_nchw.shape
    assert cin == CIN and h % 2 == 0 and w % 2 == 0 and h > K and w > K
    hi, wi = h // STRIDE, w // STRIDE
    oh = (h - K) // STRIDE + 1            # 15 for 32x32
    ow = (w - K) // STRIDE + 1            # 15
    m_comp = oh * wi                      # rows computed (OW padded to WI)
    r_pad = hi * wi + wi                  # zero-padded rows, covers max slice offset

    # ---- fold the 12 conv applications into one weight / bias set (exact) ----
    w_sum = 3.0 * jnp.sum(weights_oihw, axis=0)                     # (COUT,CIN,K,K)
    b_sum = 3.0 * jnp.sum(biases, axis=0)                           # (COUT,)
    w_mat = jnp.transpose(w_sum, (2, 3, 1, 0)).reshape(K * K, CIN, COUT)
    w_mat = jnp.pad(w_mat, ((0, 0), (0, 0), (0, COUT_PAD - COUT)))
    w_mat = w_mat.astype(jnp.bfloat16)                              # (9, 16, 128)
    b_vec = jnp.pad(b_sum, (0, COUT_PAD - COUT)).reshape(1, COUT_PAD)  # f32

    # ---- cheap space-to-batch rearrangement (no im2col patches in HBM) ----
    x_nhwc = jnp.transpose(x_nchw, (0, 2, 3, 1))                    # (N,H,W,C)
    x_sb = x_nhwc.reshape(n, hi, STRIDE, wi, STRIDE, CIN)
    x_sb = jnp.transpose(x_sb, (0, 2, 4, 1, 3, 5))                  # (N,2,2,HI,WI,C)
    x_flat = x_sb.reshape(n, STRIDE, STRIDE, hi * wi, CIN)
    x_flat = jnp.pad(x_flat, ((0, 0), (0, 0), (0, 0),
                              (0, r_pad - hi * wi), (0, 0)))        # (N,2,2,r_pad,C)

    def kernel(x_ref, w_ref, b_ref, o_ref):
        # x_ref: (1,2,2,r_pad,CIN) f32 | w_ref: (9,CIN,128) bf16
        # b_ref: (1,128) f32          | o_ref: (1,m_comp,128) f32
        acc = jnp.zeros((m_comp, COUT_PAD), jnp.float32)
        for kh in range(K):                      # static unroll: 9 tiny MXU dots
            for kw in range(K):
                ph, sh = kh % STRIDE, kh // STRIDE
                pw, sw = kw % STRIDE, kw // STRIDE
                off = sh * wi + sw               # contiguous row offset
                patch = x_ref[0, ph, pw, off:off + m_comp, :].astype(jnp.bfloat16)
                acc = acc + jnp.dot(patch, w_ref[kh * K + kw],
                                    preferred_element_type=jnp.float32)
        o_ref[0] = jnp.maximum(acc + b_ref[...], 0.0)

    flops = 2 * n * oh * ow * K * K * CIN * COUT
    bytes_accessed = (x_flat.size * 4 + w_mat.size * 2 + b_vec.size * 4
                      + n * m_comp * COUT_PAD * 4)

    out_flat = pl.pallas_call(
        kernel,
        out_shape=jax.ShapeDtypeStruct((n, m_comp, COUT_PAD), jnp.float32),
        grid=(n,),
        in_specs=[
            pl.BlockSpec((1, STRIDE, STRIDE, r_pad, CIN),
                         lambda i: (i, 0, 0, 0, 0)),
            pl.BlockSpec((K * K, CIN, COUT_PAD), lambda i: (0, 0, 0)),
            pl.BlockSpec((1, COUT_PAD), lambda i: (0, 0)),
        ],
        out_specs=pl.BlockSpec((1, m_comp, COUT_PAD), lambda i: (i, 0, 0)),
        compiler_params=pltpu.CompilerParams(
            dimension_semantics=("parallel",)),
        cost_estimate=pl.CostEstimate(flops=flops, transcendentals=0,
                                      bytes_accessed=bytes_accessed),
    )(x_flat, w_mat, b_vec)

    # (N, OH, WI, 128) -> drop padded output column + padded channels -> NCHW
    out = out_flat.reshape(n, oh, wi, COUT_PAD)[:, :, :ow, :COUT]
    return jnp.transpose(out, (0, 3, 1, 2))


# ----------------------------- references ---------------------------------- #
def _reference_forward_exact(x, weights, biases):
    """Literal torch-module semantics in f32: 12 conv applications summed, relu."""
    outs = []
    for _ in range(3):
        for i in range(N_CONVS):
            y = lax.conv_general_dilated(
                x, weights[i], (STRIDE, STRIDE), "VALID",
                dimension_numbers=("NCHW", "OIHW", "NCHW"),
                precision=lax.Precision.HIGHEST)
            outs.append(y + biases[i][None, :, None, None])
    return jnp.maximum(sum(outs), 0.0)


def _reference_folded_bf16(x, weights, biases):
    """Folded conv on the SAME bf16-rounded inputs the kernel uses (isolates kernel math)."""
    w_sum = 3.0 * jnp.sum(weights, axis=0)
    b_sum = 3.0 * jnp.sum(biases, axis=0)
    x_r = x.astype(jnp.bfloat16).astype(jnp.float32)
    w_r = w_sum.astype(jnp.bfloat16).astype(jnp.float32)
    y = lax.conv_general_dilated(
        x_r, w_r, (STRIDE, STRIDE), "VALID",
        dimension_numbers=("NCHW", "OIHW", "NCHW"),
        precision=lax.Precision.HIGHEST)
    return jnp.maximum(y + b_sum[None, :, None, None], 0.0)


if __name__ == "__main__":
    key = jax.random.PRNGKey(0)
    kx, kw_key, kb_key = jax.random.split(key, 3)

    # Deterministic synthetic parameters (PyTorch Conv2d OIHW layout).
    weights = jax.random.normal(kw_key, (N_CONVS, COUT, CIN, K, K),
                                jnp.float32) * 0.05
    biases = jax.random.normal(kb_key, (N_CONVS, COUT), jnp.float32) * 0.05

    # Input matching the module's expected shape (1, 16, 32, 32), NCHW.
    x = jax.random.normal(kx, (1, CIN, 32, 32), jnp.float32)

    out = jax.block_until_ready(jax.jit(model_forward)(x, weights, biases))
    assert out.shape == (1, COUT, 15, 15), out.shape

    # Tight check vs. a reference using identically bf16-rounded matmul inputs:
    # isolates kernel indexing / weight-folding correctness.
    ref_tight = jax.block_until_ready(_reference_folded_bf16(x, weights, biases))
    err_tight = float(jnp.max(jnp.abs(out - ref_tight)))
    assert err_tight < 2e-2, err_tight

    # Loose check vs. the exact f32 semantics of the torch module; the only
    # difference is bf16 rounding of the matmul inputs (expected < ~0.05 here).
    ref_exact = jax.block_until_ready(_reference_forward_exact(x, weights, biases))
    err_exact = float(jnp.max(jnp.abs(out - ref_exact)))
    assert err_exact < 0.15, err_exact

    print("KERNEL_OK")
</pallas_src>

<mosaic_0001>
module attributes {stable_mosaic.version = 11 : i64} {
  func.func @kernel(%arg0: i32, %arg1: memref<1x2x2x272x16xf32, #tpu.memory_space<vmem>>, %arg2: memref<9x16x128xbf16, #tpu.memory_space<vmem>>, %arg3: memref<1x128xf32, #tpu.memory_space<vmem>>, %arg4: memref<1x240x128xf32, #tpu.memory_space<vmem>>) attributes {dimension_semantics = [#tpu.dimension_semantics<parallel>], iteration_bounds = array<i64: 1>, scalar_prefetch = 0 : i64, scratch_operands = 0 : i64, tpu.core_type = #tpu.core_type<tc>, window_params = [{transform_indices = @transform_0, window_bounds = array<i64: 1, 2, 2, 272, 16>}, {pipeline_mode = #tpu.pipeline_mode<synchronous>, transform_indices = @transform_1, window_bounds = array<i64: 9, 16, 128>}, {pipeline_mode = #tpu.pipeline_mode<synchronous>, transform_indices = @transform_2, window_bounds = array<i64: 1, 128>}, {transform_indices = @transform_3, window_bounds = array<i64: 1, 240, 128>}]} {
    %cst = arith.constant 0.000000e+00 : f32
    %0 = vector.broadcast %cst : f32 to vector<240x128xf32>
    %c0 = arith.constant 0 : index
    %c0_0 = arith.constant 0 : index
    %c0_1 = arith.constant 0 : index
    %c0_2 = arith.constant 0 : index
    %c0_3 = arith.constant 0 : index
    %1 = vector.load %arg1[%c0, %c0_0, %c0_1, %c0_2, %c0_3] : memref<1x2x2x272x16xf32, #tpu.memory_space<vmem>>, vector<1x1x1x240x16xf32>
    %2 = vector.shape_cast %1 : vector<1x1x1x240x16xf32> to vector<240x16xf32>
    %3 = arith.truncf %2 : vector<240x16xf32> to vector<240x16xbf16>
    %c0_4 = arith.constant 0 : index
    %c0_5 = arith.constant 0 : index
    %c0_6 = arith.constant 0 : index
    %4 = vector.load %arg2[%c0_4, %c0_5, %c0_6] : memref<9x16x128xbf16, #tpu.memory_space<vmem>>, vector<1x16x128xbf16>
    %5 = vector.shape_cast %4 : vector<1x16x128xbf16> to vector<16x128xbf16>
    %cst_7 = arith.constant dense<0.000000e+00> : vector<240x128xf32>
    %6 = tpu.matmul %3, %5, %cst_7 {dimension_numbers = #tpu.dot_dimension_numbers<[1], [0], [0], [1], [0, 0, 1, 1], [], []>} : vector<240x16xbf16>, vector<16x128xbf16>, vector<240x128xf32> -> vector<240x128xf32>
    %7 = arith.addf %0, %6 : vector<240x128xf32>
    %c0_8 = arith.constant 0 : index
    %c0_9 = arith.constant 0 : index
    %c1 = arith.constant 1 : index
    %c0_10 = arith.constant 0 : index
    %c0_11 = arith.constant 0 : index
    %8 = vector.load %arg1[%c0_8, %c0_9, %c1, %c0_10, %c0_11] : memref<1x2x2x272x16xf32, #tpu.memory_space<vmem>>, vector<1x1x1x240x16xf32>
    %9 = vector.shape_cast %8 : vector<1x1x1x240x16xf32> to vector<240x16xf32>
    %10 = arith.truncf %9 : vector<240x16xf32> to vector<240x16xbf16>
    %c1_12 = arith.constant 1 : index
    %c0_13 = arith.constant 0 : index
    %c0_14 = arith.constant 0 : index
    %11 = vector.load %arg2[%c1_12, %c0_13, %c0_14] : memref<9x16x128xbf16, #tpu.memory_space<vmem>>, vector<1x16x128xbf16>
    %12 = vector.shape_cast %11 : vector<1x16x128xbf16> to vector<16x128xbf16>
    %cst_15 = arith.constant dense<0.000000e+00> : vector<240x128xf32>
    %13 = tpu.matmul %10, %12, %cst_15 {dimension_numbers = #tpu.dot_dimension_numbers<[1], [0], [0], [1], [0, 0, 1, 1], [], []>} : vector<240x16xbf16>, vector<16x128xbf16>, vector<240x128xf32> -> vector<240x128xf32>
    %14 = arith.addf %7, %13 : vector<240x128xf32>
    %c0_16 = arith.constant 0 : index
    %c0_17 = arith.constant 0 : index
    %c0_18 = arith.constant 0 : index
    %c1_19 = arith.constant 1 : index
    %c0_20 = arith.constant 0 : index
    %15 = vector.load %arg1[%c0_16, %c0_17, %c0_18, %c1_19, %c0_20] : memref<1x2x2x272x16xf32, #tpu.memory_space<vmem>>, vector<1x1x1x240x16xf32>
    %16 = vector.shape_cast %15 : vector<1x1x1x240x16xf32> to vector<240x16xf32>
    %17 = arith.truncf %16 : vector<240x16xf32> to vector<240x16xbf16>
    %c2 = arith.constant 2 : index
    %c0_21 = arith.constant 0 : index
    %c0_22 = arith.constant 0 : index
    %18 = vector.load %arg2[%c2, %c0_21, %c0_22] : memref<9x16x128xbf16, #tpu.memory_space<vmem>>, vector<1x16x128xbf16>
    %19 = vector.shape_cast %18 : vector<1x16x128xbf16> to vector<16x128xbf16>
    %cst_23 = arith.constant dense<0.000000e+00> : vector<240x128xf32>
    %20 = tpu.matmul %17, %19, %cst_23 {dimension_numbers = #tpu.dot_dimension_numbers<[1], [0], [0], [1], [0, 0, 1, 1], [], []>} : vector<240x16xbf16>, vector<16x128xbf16>, vector<240x128xf32> -> vector<240x128xf32>
    %21 = arith.addf %14, %20 : vector<240x128xf32>
    %c0_24 = arith.constant 0 : index
    %c1_25 = arith.constant 1 : index
    %c0_26 = arith.constant 0 : index
    %c0_27 = arith.constant 0 : index
    %c0_28 = arith.constant 0 : index
    %22 = vector.load %arg1[%c0_24, %c1_25, %c0_26, %c0_27, %c0_28] : memref<1x2x2x272x16xf32, #tpu.memory_space<vmem>>, vector<1x1x1x240x16xf32>
    %23 = vector.shape_cast %22 : vector<1x1x1x240x16xf32> to vector<240x16xf32>
    %24 = arith.truncf %23 : vector<240x16xf32> to vector<240x16xbf16>
    %c3 = arith.constant 3 : index
    %c0_29 = arith.constant 0 : index
    %c0_30 = arith.constant 0 : index
    %25 = vector.load %arg2[%c3, %c0_29, %c0_30] : memref<9x16x128xbf16, #tpu.memory_space<vmem>>, vector<1x16x128xbf16>
    %26 = vector.shape_cast %25 : vector<1x16x128xbf16> to vector<16x128xbf16>
    %cst_31 = arith.constant dense<0.000000e+00> : vector<240x128xf32>
    %27 = tpu.matmul %24, %26, %cst_31 {dimension_numbers = #tpu.dot_dimension_numbers<[1], [0], [0], [1], [0, 0, 1, 1], [], []>} : vector<240x16xbf16>, vector<16x128xbf16>, vector<240x128xf32> -> vector<240x128xf32>
    %28 = arith.addf %21, %27 : vector<240x128xf32>
    %c0_32 = arith.constant 0 : index
    %c1_33 = arith.constant 1 : index
    %c1_34 = arith.constant 1 : index
    %c0_35 = arith.constant 0 : index
    %c0_36 = arith.constant 0 : index
    %29 = vector.load %arg1[%c0_32, %c1_33, %c1_34, %c0_35, %c0_36] : memref<1x2x2x272x16xf32, #tpu.memory_space<vmem>>, vector<1x1x1x240x16xf32>
    %30 = vector.shape_cast %29 : vector<1x1x1x240x16xf32> to vector<240x16xf32>
    %31 = arith.truncf %30 : vector<240x16xf32> to vector<240x16xbf16>
    %c4 = arith.constant 4 : index
    %c0_37 = arith.constant 0 : index
    %c0_38 = arith.constant 0 : index
    %32 = vector.load %arg2[%c4, %c0_37, %c0_38] : memref<9x16x128xbf16, #tpu.memory_space<vmem>>, vector<1x16x128xbf16>
    %33 = vector.shape_cast %32 : vector<1x16x128xbf16> to vector<16x128xbf16>
    %cst_39 = arith.constant dense<0.000000e+00> : vector<240x128xf32>
    %34 = tpu.matmul %31, %33, %cst_39 {dimension_numbers = #tpu.dot_dimension_numbers<[1], [0], [0], [1], [0, 0, 1, 1], [], []>} : vector<240x16xbf16>, vector<16x128xbf16>, vector<240x128xf32> -> vector<240x128xf32>
    %35 = arith.addf %28, %34 : vector<240x128xf32>
    %c0_40 = arith.constant 0 : index
    %c1_41 = arith.constant 1 : index
    %c0_42 = arith.constant 0 : index
    %c1_43 = arith.constant 1 : index
    %c0_44 = arith.constant 0 : index
    %36 = vector.load %arg1[%c0_40, %c1_41, %c0_42, %c1_43, %c0_44] : memref<1x2x2x272x16xf32, #tpu.memory_space<vmem>>, vector<1x1x1x240x16xf32>
    %37 = vector.shape_cast %36 : vector<1x1x1x240x16xf32> to vector<240x16xf32>
    %38 = arith.truncf %37 : vector<240x16xf32> to vector<240x16xbf16>
    %c5 = arith.constant 5 : index
    %c0_45 = arith.constant 0 : index
    %c0_46 = arith.constant 0 : index
    %39 = vector.load %arg2[%c5, %c0_45, %c0_46] : memref<9x16x128xbf16, #tpu.memory_space<vmem>>, vector<1x16x128xbf16>
    %40 = vector.shape_cast %39 : vector<1x16x128xbf16> to vector<16x128xbf16>
    %cst_47 = arith.constant dense<0.000000e+00> : vector<240x128xf32>
    %41 = tpu.matmul %38, %40, %cst_47 {dimension_numbers = #tpu.dot_dimension_numbers<[1], [0], [0], [1], [0, 0, 1, 1], [], []>} : vector<240x16xbf16>, vector<16x128xbf16>, vector<240x128xf32> -> vector<240x128xf32>
    %42 = arith.addf %35, %41 : vector<240x128xf32>
    %c0_48 = arith.constant 0 : index
    %c0_49 = arith.constant 0 : index
    %c0_50 = arith.constant 0 : index
    %c16 = arith.constant 16 : index
    %c0_51 = arith.constant 0 : index
    %43 = vector.load %arg1[%c0_48, %c0_49, %c0_50, %c16, %c0_51] : memref<1x2x2x272x16xf32, #tpu.memory_space<vmem>>, vector<1x1x1x240x16xf32>
    %44 = vector.shape_cast %43 : vector<1x1x1x240x16xf32> to vector<240x16xf32>
    %45 = arith.truncf %44 : vector<240x16xf32> to vector<240x16xbf16>
    %c6 = arith.constant 6 : index
    %c0_52 = arith.constant 0 : index
    %c0_53 = arith.constant 0 : index
    %46 = vector.load %arg2[%c6, %c0_52, %c0_53] : memref<9x16x128xbf16, #tpu.memory_space<vmem>>, vector<1x16x128xbf16>
    %47 = vector.shape_cast %46 : vector<1x16x128xbf16> to vector<16x128xbf16>
    %cst_54 = arith.constant dense<0.000000e+00> : vector<240x128xf32>
    %48 = tpu.matmul %45, %47, %cst_54 {dimension_numbers = #tpu.dot_dimension_numbers<[1], [0], [0], [1], [0, 0, 1, 1], [], []>} : vector<240x16xbf16>, vector<16x128xbf16>, vector<240x128xf32> -> vector<240x128xf32>
    %49 = arith.addf %42, %48 : vector<240x128xf32>
    %c0_55 = arith.constant 0 : index
    %c0_56 = arith.constant 0 : index
    %c1_57 = arith.constant 1 : index
    %c16_58 = arith.constant 16 : index
    %c0_59 = arith.constant 0 : index
    %50 = vector.load %arg1[%c0_55, %c0_56, %c1_57, %c16_58, %c0_59] : memref<1x2x2x272x16xf32, #tpu.memory_space<vmem>>, vector<1x1x1x240x16xf32>
    %51 = vector.shape_cast %50 : vector<1x1x1x240x16xf32> to vector<240x16xf32>
    %52 = arith.truncf %51 : vector<240x16xf32> to vector<240x16xbf16>
    %c7 = arith.constant 7 : index
    %c0_60 = arith.constant 0 : index
    %c0_61 = arith.constant 0 : index
    %53 = vector.load %arg2[%c7, %c0_60, %c0_61] : memref<9x16x128xbf16, #tpu.memory_space<vmem>>, vector<1x16x128xbf16>
    %54 = vector.shape_cast %53 : vector<1x16x128xbf16> to vector<16x128xbf16>
    %cst_62 = arith.constant dense<0.000000e+00> : vector<240x128xf32>
    %55 = tpu.matmul %52, %54, %cst_62 {dimension_numbers = #tpu.dot_dimension_numbers<[1], [0], [0], [1], [0, 0, 1, 1], [], []>} : vector<240x16xbf16>, vector<16x128xbf16>, vector<240x128xf32> -> vector<240x128xf32>
    %56 = arith.addf %49, %55 : vector<240x128xf32>
    %c0_63 = arith.constant 0 : index
    %c0_64 = arith.constant 0 : index
    %c0_65 = arith.constant 0 : index
    %c17 = arith.constant 17 : index
    %c0_66 = arith.constant 0 : index
    %57 = vector.load %arg1[%c0_63, %c0_64, %c0_65, %c17, %c0_66] : memref<1x2x2x272x16xf32, #tpu.memory_space<vmem>>, vector<1x1x1x240x16xf32>
    %58 = vector.shape_cast %57 : vector<1x1x1x240x16xf32> to vector<240x16xf32>
    %59 = arith.truncf %58 : vector<240x16xf32> to vector<240x16xbf16>
    %c8 = arith.constant 8 : index
    %c0_67 = arith.constant 0 : index
    %c0_68 = arith.constant 0 : index
    %60 = vector.load %arg2[%c8, %c0_67, %c0_68] : memref<9x16x128xbf16, #tpu.memory_space<vmem>>, vector<1x16x128xbf16>
    %61 = vector.shape_cast %60 : vector<1x16x128xbf16> to vector<16x128xbf16>
    %cst_69 = arith.constant dense<0.000000e+00> : vector<240x128xf32>
    %62 = tpu.matmul %59, %61, %cst_69 {dimension_numbers = #tpu.dot_dimension_numbers<[1], [0], [0], [1], [0, 0, 1, 1], [], []>} : vector<240x16xbf16>, vector<16x128xbf16>, vector<240x128xf32> -> vector<240x128xf32>
    %63 = arith.addf %56, %62 : vector<240x128xf32>
    %c0_70 = arith.constant 0 : index
    %c0_71 = arith.constant 0 : index
    %64 = vector.load %arg3[%c0_70, %c0_71] : memref<1x128xf32, #tpu.memory_space<vmem>>, vector<1x128xf32>
    %65 = vector.broadcast %64 : vector<1x128xf32> to vector<240x128xf32>
    %66 = arith.addf %63, %65 : vector<240x128xf32>
    %cst_72 = arith.constant 0.000000e+00 : f32
    %67 = vector.broadcast %cst_72 : f32 to vector<240x128xf32>
    %68 = arith.maximumf %66, %67 : vector<240x128xf32>
    %c0_73 = arith.constant 0 : index
    %c0_74 = arith.constant 0 : index
    %c0_75 = arith.constant 0 : index
    %69 = vector.load %arg4[%c0_73, %c0_74, %c0_75] : memref<1x240x128xf32, #tpu.memory_space<vmem>>, vector<1x240x128xf32>
    %70 = vector.shape_cast %69 : vector<1x240x128xf32> to vector<240x128xf32>
    %71 = vector.shape_cast %68 : vector<240x128xf32> to vector<1x240x128xf32>
    tpu.vector_store %arg4[%c0_73, %c0_74, %c0_75], %71 {strides = array<i32>} : memref<1x240x128xf32, #tpu.memory_space<vmem>>, vector<1x240x128xf32>,
    return
  }
  func.func @transform_0(%arg0: i32) -> (i32, i32, i32, i32, i32) {
    %c0_i32 = arith.constant 0 : i32
    %c0_i32_0 = arith.constant 0 : i32
    %c0_i32_1 = arith.constant 0 : i32
    %c0_i32_2 = arith.constant 0 : i32
    %c0_i32_3 = arith.constant 0 : i32
    return %arg0, %c0_i32, %c0_i32_0, %c0_i32_1, %c0_i32_2 : i32, i32, i32, i32, i32
  }
  func.func @transform_1(%arg0: i32) -> (i32, i32, i32) {
    %c0_i32 = arith.constant 0 : i32
    %c0_i32_0 = arith.constant 0 : i32
    %c0_i32_1 = arith.constant 0 : i32
    %c0_i32_2 = arith.constant 0 : i32
    return %c0_i32, %c0_i32_0, %c0_i32_1 : i32, i32, i32
  }
  func.func @transform_2(%arg0: i32) -> (i32, i32) {
    %c0_i32 = arith.constant 0 : i32
    %c0_i32_0 = arith.constant 0 : i32
    %c0_i32_1 = arith.constant 0 : i32
    return %c0_i32, %c0_i32_0 : i32, i32
  }
  func.func @transform_3(%arg0: i32) -> (i32, i32, i32) {
    %c0_i32 = arith.constant 0 : i32
    %c0_i32_0 = arith.constant 0 : i32
    %c0_i32_1 = arith.constant 0 : i32
    return %arg0, %c0_i32, %c0_i32_0 : i32, i32, i32
  }
}

</mosaic_0001>

<bundles_post_ra>
// kernel: model_forward.1
= control target key start
LH: loop header
LB: loop body
LE: loop exit
PB: predicated region body
PF: predicated region fallthrough
CT: control target
= control target key end

     0   :  { %v3623_v0 = vmov 0.0   ;;  %vm3624_vm0 = vmmov 0   ;;  %vm117_vm1 = vcmask 130048   ;;  %s5368_s1 = inlined_call_operand.vmem [shape: bf16[9,16,128], index: 1, kind: input, shape index: {}]   ;;  %s5369_s0 = inlined_call_operand.vmem [shape: f32[1,2,2,272,16], index: 0, kind: input, shape index: {}]   ;;  %s5370_s2 = inlined_call_operand.vmem [shape: f32[1,128], index: 2, kind: input, shape index: {}]   ;;  %s5371_s3 = inlined_call_operand.vmem [shape: f32[1,240,128], index: 3, kind: output, shape index: {}]  }
   0x1   :  { %3052 = vmatprep.subr.bf16.mxu0 %v3623_v0  ;;  %3610 = vmatprep.subr.bf16.mxu1 %v3623_v0  ;;  %v3614_v1 = vld [vmem:[%s5368_s1 + $0x8] sm:$0xff]   ;;  %v2597_v2 = vld [vmem:[%s5369_s0 + $0x110] sm:$0xff]  ;;  %v2598_v3 = vld [vmem:[%s5369_s0 + $0x118] sm:$0xff] }
   0x2   :  { %3054 = vmatprep.mubr.msk.bf16.mxu0 %vm3624_vm0, %v3623_v0  ;;  %3086 = vmatprep.mubr.msk.bf16.mxu1 %vm3624_vm0, %v3623_v0  ;;  %v2613_v4 = vld [vmem:[%s5369_s0 + $0x190] sm:$0xff]  ;;  %v93_v5 = vpack.c.bf16 %v2598_v3, %v2597_v2  ;;  %v2614_v6 = vld [vmem:[%s5369_s0 + $0x198] sm:$0xff]  ;;  %v3616_v9 = vld [vmem:[%s5368_s1] sm:$0xff]  }
   0x3   :  { %3053 = vmatpush3.bf16.msra.mxu0 %v3614_v1  ;;  %3611 = vmatpush3.bf16.msra.mxu1 %v3614_v1  ;;  %v101_v7 = vpack.c.bf16 %v2614_v6, %v2613_v4  ;;  %v3615_v8 = vld [vmem:[%s5368_s1 + $0x10] sm:$0xff]   ;;  %v2599_v10 = vld [vmem:[%s5369_s0 + $0x120] sm:$0xff]  ;;  %v2600_v11 = vld [vmem:[%s5369_s0 + $0x128] sm:$0xff] }
   0x4   :  { %3176 = vmatprep.subr.bf16.mxu0 %v3623_v0  ;;  %3114 = vmatprep.subr.bf16.mxu1 %v3623_v0  ;;  %v2615_v12 = vld [vmem:[%s5369_s0 + $0x1a0] sm:$0xff]  ;;  %v2616_v13 = vld [vmem:[%s5369_s0 + $0x1a8] sm:$0xff]  ;;  %v94_v14 = vpack.c.bf16 %v2600_v11, %v2599_v10  ;;  %v2601_v16 = vld [vmem:[%s5369_s0 + $0x130] sm:$0xff] }
   0x5   :  { %v102_v15 = vpack.c.bf16 %v2616_v13, %v2615_v12  ;;  %v2602_v17 = vld [vmem:[%s5369_s0 + $0x138] sm:$0xff]  ;;  %v2617_v18 = vld [vmem:[%s5369_s0 + $0x1b0] sm:$0xff]  ;;  %v2603_v22 = vld [vmem:[%s5369_s0 + $0x140] sm:$0xff] }
   0x6   :  { %3055 = vmatmul.mubr.msk.bf16.vlgmr.msra.gmra.mrb[0].mxu0 %vm117_vm1, %v93_v5  ;;  %3087 = vmatmul.mubr.msk.bf16.vlgmr.msra.gmra.mrb[0].mxu1 %vm117_vm1, %v101_v7  ;;  %v2618_v19 = vld [vmem:[%s5369_s0 + $0x1b8] sm:$0xff]  ;;  %v95_v20 = vpack.c.bf16 %v2602_v17, %v2601_v16  ;;  %v2604_v23 = vld [vmem:[%s5369_s0 + $0x148] sm:$0xff]  ;;  %v2619_v24 = vld [vmem:[%s5369_s0 + $0x1c0] sm:$0xff] }
   0x7   :  { %3177 = vmatpush3.bf16.msra.mxu0 %v3615_v8  ;;  %3058 = vmatprep.mubr.msk.bf16.mxu0 %vm3624_vm0, %v3623_v0  ;;  %v103_v21 = vpack.c.bf16 %v2618_v19, %v2617_v18  ;;  %v2620_v25 = vld [vmem:[%s5369_s0 + $0x1c8] sm:$0xff]  ;;  %v96_v26 = vpack.c.bf16 %v2604_v23, %v2603_v22  ;;  %v2605_v28 = vld [vmem:[%s5369_s0 + $0x150] sm:$0xff]  ;;  %v2606_v29 = vld [vmem:[%s5369_s0 + $0x158] sm:$0xff] }
   0x8   :  { %3090 = vmatprep.mubr.msk.bf16.mxu1 %vm3624_vm0, %v3623_v0  ;;  %3115 = vmatpush3.bf16.msra.mxu1 %v3616_v9  ;;  %v104_v27 = vpack.c.bf16 %v2620_v25, %v2619_v24  ;;  %v2621_v30 = vld [vmem:[%s5369_s0 + $0x1d0] sm:$0xff]  ;;  %v2622_v31 = vld [vmem:[%s5369_s0 + $0x1d8] sm:$0xff]  ;;  %v97_v32 = vpack.c.bf16 %v2606_v29, %v2605_v28  ;;  %v2607_v34 = vld [vmem:[%s5369_s0 + $0x160] sm:$0xff] }
   0x9   :  { %3238 = vmatprep.subr.bf16.mxu1 %v3623_v0  ;;  %3300 = vmatprep.subr.bf16.mxu0 %v3623_v0  ;;  %v105_v33 = vpack.c.bf16 %v2622_v31, %v2621_v30  ;;  %v2608_v35 = vld [vmem:[%s5369_s0 + $0x168] sm:$0xff]  ;;  %v2623_v36 = vld [vmem:[%s5369_s0 + $0x1e0] sm:$0xff]  ;;  %v2609_v40 = vld [vmem:[%s5369_s0 + $0x170] sm:$0xff] }
   0xa   :  { %v2624_v37 = vld [vmem:[%s5369_s0 + $0x1e8] sm:$0xff]  ;;  %v98_v38 = vpack.c.bf16 %v2608_v35, %v2607_v34  ;;  %v2610_v41 = vld [vmem:[%s5369_s0 + $0x178] sm:$0xff]  ;;  %v2625_v42 = vld [vmem:[%s5369_s0 + $0x1f0] sm:$0xff] }
   0xb   :  { %v106_v39 = vpack.c.bf16 %v2624_v37, %v2623_v36  ;;  %v2626_v43 = vld [vmem:[%s5369_s0 + $0x1f8] sm:$0xff]  ;;  %v99_v44 = vpack.c.bf16 %v2610_v41, %v2609_v40  ;;  %v2611_v46 = vld [vmem:[%s5369_s0 + $0x180] sm:$0xff]  ;;  %v2612_v47 = vld [vmem:[%s5369_s0 + $0x188] sm:$0xff] }
   0xc   :  { %v107_v45 = vpack.c.bf16 %v2626_v43, %v2625_v42  ;;  %v15_v48 = vld [vmem:[%s5369_s0] sm:$0xff]  ;;  %v16_v49 = vld [vmem:[%s5369_s0 + $0x8] sm:$0xff]  ;;  %v100_v50 = vpack.c.bf16 %v2612_v47, %v2611_v46  ;;  %v3617_v52 = vld [vmem:[%s5368_s1 + $0x18] sm:$0xff]  }
   0xd   :  { %v45_v51 = vpack.c.bf16 %v16_v49, %v15_v48  ;;  %v17_v53 = vld [vmem:[%s5369_s0 + $0x10] sm:$0xff]  ;;  %v18_v54 = vld [vmem:[%s5369_s0 + $0x18] sm:$0xff]  ;;  %v520_v55 = vld [vmem:[%s5369_s0 + $0x1] sm:$0xff] }
   0xe   :  { %3059 = vmatmul.mubr.msk.bf16.gmra.mrb[4].mxu0 %vm117_vm1, %v94_v14  ;;  %3091 = vmatmul.mubr.msk.bf16.gmra.mrb[4].mxu1 %vm117_vm1, %v102_v15  ;;  %v521_v56 = vld [vmem:[%s5369_s0 + $0x9] sm:$0xff]  ;;  %v3824_v57 = vpack.c.bf16 %v18_v54, %v17_v53  ;;  %v3618_v59 = vld [vmem:[%s5368_s1 + $0x20] sm:$0xff]   ;;  %v522_v62 = vld [vmem:[%s5369_s0 + $0x11] sm:$0xff] }
   0xf   :  { %3062 = vmatprep.mubr.msk.bf16.mxu0 %vm3624_vm0, %v3623_v0  ;;  %3094 = vmatprep.mubr.msk.bf16.mxu1 %vm3624_vm0, %v3623_v0  ;;  %v550_v58 = vpack.c.bf16 %v521_v56, %v520_v55  ;;  %v19_v60 = vld [vmem:[%s5369_s0 + $0x20] sm:$0xff]  ;;  %v20_v61 = vld [vmem:[%s5369_s0 + $0x28] sm:$0xff]  ;;  %v21_v3 = vld [vmem:[%s5369_s0 + $0x30] sm:$0xff] }
  0x10   :  { %v523_v63 = vld [vmem:[%s5369_s0 + $0x19] sm:$0xff]  ;;  %v3849_v1 = vpack.c.bf16 %v20_v61, %v19_v60  ;;  %v524_v5 = vld [vmem:[%s5369_s0 + $0x21] sm:$0xff]  ;;  %v525_v6 = vld [vmem:[%s5369_s0 + $0x29] sm:$0xff] }
  0x11   :  { %v551_v2 = vpack.c.bf16 %v523_v63, %v522_v62  ;;  %v22_v4 = vld [vmem:[%s5369_s0 + $0x38] sm:$0xff]  ;;  %v552_v8 = vpack.c.bf16 %v525_v6, %v524_v5  ;;  %v23_v9 = vld [vmem:[%s5369_s0 + $0x40] sm:$0xff]  ;;  %v24_v10 = vld [vmem:[%s5369_s0 + $0x48] sm:$0xff] }
  0x12   :  { %v3870_v7 = vpack.c.bf16 %v22_v4, %v21_v3  ;;  %v526_v11 = vld [vmem:[%s5369_s0 + $0x31] sm:$0xff]  ;;  %v527_v12 = vld [vmem:[%s5369_s0 + $0x39] sm:$0xff]  ;;  %v3891_v13 = vpack.c.bf16 %v24_v10, %v23_v9  ;;  %v528_v17 = vld [vmem:[%s5369_s0 + $0x41] sm:$0xff] }
  0x13   :  { %v553_v14 = vpack.c.bf16 %v527_v12, %v526_v11  ;;  %v25_v15 = vld [vmem:[%s5369_s0 + $0x50] sm:$0xff]  ;;  %v26_v16 = vld [vmem:[%s5369_s0 + $0x58] sm:$0xff]  ;;  %v28_v22 = vld [vmem:[%s5369_s0 + $0x68] sm:$0xff] }
  0x14   :  { %v529_v18 = vld [vmem:[%s5369_s0 + $0x49] sm:$0xff]  ;;  %v3912_v19 = vpack.c.bf16 %v26_v16, %v25_v15  ;;  %v530_v23 = vld [vmem:[%s5369_s0 + $0x51] sm:$0xff]  ;;  %v531_v24 = vld [vmem:[%s5369_s0 + $0x59] sm:$0xff] }
  0x15   :  { %v30_v28 = vld [vmem:[%s5369_s0 + $0x78] sm:$0xff]  ;;  %v532_v29 = vld [vmem:[%s5369_s0 + $0x61] sm:$0xff]  ;;  %v533_v30 = vld [vmem:[%s5369_s0 + $0x69] sm:$0xff] }
  0x16   :  { %3063 = vmatmul.mubr.msk.bf16.gmra.mrb[8].mxu0 %vm117_vm1, %v95_v20  ;;  %3095 = vmatmul.mubr.msk.bf16.gmra.mrb[8].mxu1 %vm117_vm1, %v103_v21  ;;  %v554_v20 = vpack.c.bf16 %v529_v18, %v528_v17  ;;  %v27_v21 = vld [vmem:[%s5369_s0 + $0x60] sm:$0xff]  ;;  %v32_v34 = vld [vmem:[%s5369_s0 + $0x88] sm:$0xff]  ;;  %v534_v35 = vld [vmem:[%s5369_s0 + $0x71] sm:$0xff] }
  0x17   :  { %3066 = vmatprep.mubr.msk.bf16.mxu0 %vm3624_vm0, %v3623_v0  ;;  %3098 = vmatprep.mubr.msk.bf16.mxu1 %vm3624_vm0, %v3623_v0  ;;  %v3933_v25 = vpack.c.bf16 %v28_v22, %v27_v21  ;;  %v535_v36 = vld [vmem:[%s5369_s0 + $0x79] sm:$0xff]  ;;  %v536_v41 = vld [vmem:[%s5369_s0 + $0x81] sm:$0xff]  ;;  %v537_v42 = vld [vmem:[%s5369_s0 + $0x89] sm:$0xff] }
  0x18   :  { %v34_v40 = vld [vmem:[%s5369_s0 + $0x98] sm:$0xff]  ;;  %v36_v46 = vld [vmem:[%s5369_s0 + $0xa8] sm:$0xff]  ;;  %v43_v9 = vld [vmem:[%s5369_s0 + $0xe0] sm:$0xff] }
  0x19   :  { %v538_v47 = vld [vmem:[%s5369_s0 + $0x91] sm:$0xff]  ;;  %v539_v48 = vld [vmem:[%s5369_s0 + $0x99] sm:$0xff]  ;;  %v540_v53 = vld [vmem:[%s5369_s0 + $0xa1] sm:$0xff] }
  0x1a   :  { %v541_v54 = vld [vmem:[%s5369_s0 + $0xa9] sm:$0xff]  ;;  %v542_v60 = vld [vmem:[%s5369_s0 + $0xb1] sm:$0xff]  ;;  %v543_v61 = vld [vmem:[%s5369_s0 + $0xb9] sm:$0xff] }
  0x1b   :  { %v560_v56 = vpack.c.bf16 %v541_v54, %v540_v53  ;;  %v561_v63 = vpack.c.bf16 %v543_v61, %v542_v60  ;;  %v42_v3 = vld [vmem:[%s5369_s0 + $0xd8] sm:$0xff]  ;;  %v544_v4 = vld [vmem:[%s5369_s0 + $0xc1] sm:$0xff]  ;;  %v545_v5 = vld [vmem:[%s5369_s0 + $0xc9] sm:$0xff] }
  0x1c   :  { %v44_v10 = vld [vmem:[%s5369_s0 + $0xe8] sm:$0xff]  ;;  %v546_v11 = vld [vmem:[%s5369_s0 + $0xd1] sm:$0xff]  ;;  %v547_v12 = vld [vmem:[%s5369_s0 + $0xd9] sm:$0xff] }
  0x1d   :  { %v563_v15 = vpack.c.bf16 %v547_v12, %v546_v11  ;;  %v548_v16 = vld [vmem:[%s5369_s0 + $0xe1] sm:$0xff]  ;;  %v549_v17 = vld [vmem:[%s5369_s0 + $0xe9] sm:$0xff]  ;;  %v2736_v54 = vld [vmem:[%s5369_s0 + $0x378] sm:$0xff] }
  0x1e   :  { %3067 = vmatmul.mubr.msk.bf16.gmra.mrb[12].mxu0 %vm117_vm1, %v96_v26  ;;  %3099 = vmatmul.mubr.msk.bf16.gmra.mrb[12].mxu1 %vm117_vm1, %v104_v27  ;;  %v555_v26 = vpack.c.bf16 %v531_v24, %v530_v23  ;;  %v29_v27 = vld [vmem:[%s5369_s0 + $0x70] sm:$0xff]  ;;  %v2679_v18 = vld [vmem:[%s5369_s0 + $0x220] sm:$0xff]  ;;  %v564_v21 = vpack.c.bf16 %v549_v17, %v548_v16  ;;  %v3619_v23 = vld [vmem:[%s5368_s1 + $0x28] sm:$0xff]  }
  0x1f   :  { %3070 = vmatprep.mubr.msk.bf16.mxu0 %vm3624_vm0, %v3623_v0  ;;  %3102 = vmatprep.mubr.msk.bf16.mxu1 %vm3624_vm0, %v3623_v0  ;;  %v3954_v31 = vpack.c.bf16 %v30_v28, %v29_v27  ;;  %v2681_v24 = vld [vmem:[%s5369_s0 + $0x230] sm:$0xff]  ;;  %v2728_v28 = vld [vmem:[%s5369_s0 + $0x338] sm:$0xff] }
  0x20   :  { %v2727_v27 = vld [vmem:[%s5369_s0 + $0x330] sm:$0xff] }
  0x21   :  { %v2735_v53 = vld [vmem:[%s5369_s0 + $0x370] sm:$0xff] }
  0x22   :  { %v1120_v61 = vpack.c.bf16 %v2736_v54, %v2735_v53  ;;  %v2743_v53 = vld [vmem:[%s5369_s0 + $0x3b0] sm:$0xff]  ;;  %v2744_v54 = vld [vmem:[%s5369_s0 + $0x3b8] sm:$0xff] }
  0x26   :  { %3071 = vmatmul.mubr.msk.bf16.gmra.mrb[16].mxu0 %vm117_vm1, %v97_v32  ;;  %3103 = vmatmul.mubr.msk.bf16.gmra.mrb[16].mxu1 %vm117_vm1, %v105_v33  ;;  %v556_v32 = vpack.c.bf16 %v533_v30, %v532_v29  ;;  %v31_v33 = vld [vmem:[%s5369_s0 + $0x80] sm:$0xff]  ;;  %v1116_v30 = vpack.c.bf16 %v2728_v28, %v2727_v27 }
  0x27   :  { %3074 = vmatprep.mubr.msk.bf16.mxu0 %vm3624_vm0, %v3623_v0  ;;  %3106 = vmatprep.mubr.msk.bf16.mxu1 %vm3624_vm0, %v3623_v0  ;;  %v53_v37 = vpack.c.bf16 %v32_v34, %v31_v33  ;;  %v2683_v33 = vld [vmem:[%s5369_s0 + $0x240] sm:$0xff]  ;;  %v2684_v34 = vld [vmem:[%s5369_s0 + $0x248] sm:$0xff] }
  0x2e   :  { %3075 = vmatmul.mubr.msk.bf16.gmra.mrb[20].mxu0 %vm117_vm1, %v98_v38  ;;  %3107 = vmatmul.mubr.msk.bf16.gmra.mrb[20].mxu1 %vm117_vm1, %v106_v39  ;;  %v557_v38 = vpack.c.bf16 %v535_v36, %v534_v35  ;;  %v33_v39 = vld [vmem:[%s5369_s0 + $0x90] sm:$0xff]  ;;  %v2729_v35 = vld [vmem:[%s5369_s0 + $0x340] sm:$0xff]  ;;  %v2730_v36 = vld [vmem:[%s5369_s0 + $0x348] sm:$0xff] }
  0x2f   :  { %3078 = vmatprep.mubr.msk.bf16.mxu0 %vm3624_vm0, %v3623_v0  ;;  %3110 = vmatprep.mubr.msk.bf16.mxu1 %vm3624_vm0, %v3623_v0  ;;  %v54_v43 = vpack.c.bf16 %v34_v40, %v33_v39  ;;  %v2685_v39 = vld [vmem:[%s5369_s0 + $0x250] sm:$0xff]  ;;  %v2686_v40 = vld [vmem:[%s5369_s0 + $0x258] sm:$0xff] }
  0x36   :  { %3079 = vmatmul.mubr.msk.bf16.gmra.mrb[24].mxu0 %vm117_vm1, %v99_v44  ;;  %3111 = vmatmul.mubr.msk.bf16.gmra.mrb[24].mxu1 %vm117_vm1, %v107_v45  ;;  %v558_v44 = vpack.c.bf16 %v537_v42, %v536_v41  ;;  %v35_v45 = vld [vmem:[%s5369_s0 + $0xa0] sm:$0xff]  ;;  %v2731_v41 = vld [vmem:[%s5369_s0 + $0x350] sm:$0xff]  ;;  %v2732_v42 = vld [vmem:[%s5369_s0 + $0x358] sm:$0xff] }
  0x37   :  { %3082 = vmatprep.mubr.msk.bf16.mxu0 %vm3624_vm0, %v3623_v0  ;;  %3116 = vmatprep.mubr.msk.bf16.mxu1 %vm3624_vm0, %v3623_v0  ;;  %v55_v49 = vpack.c.bf16 %v36_v46, %v35_v45  ;;  %v2687_v45 = vld [vmem:[%s5369_s0 + $0x260] sm:$0xff]  ;;  %v2688_v46 = vld [vmem:[%s5369_s0 + $0x268] sm:$0xff] }
  0x3e   :  { %3083 = vmatmul.mubr.msk.bf16.gmra.mrb[28].mxu0 %vm117_vm1, %v100_v50  ;;  %3117 = vmatmul.mubr.msk.bf16.vlgmr.msra.gmra.mrb[28].mxu1 %vm117_vm1, %v45_v51  ;;  %v559_v50 = vpack.c.bf16 %v539_v48, %v538_v47  ;;  %v37_v51 = vld [vmem:[%s5369_s0 + $0xb0] sm:$0xff]  ;;  %v2733_v47 = vld [vmem:[%s5369_s0 + $0x360] sm:$0xff]  ;;  %v2734_v48 = vld [vmem:[%s5369_s0 + $0x368] sm:$0xff] }
  0x3f   :  { %3120 = vmatprep.mubr.msk.bf16.mxu1 %vm3624_vm0, %v3623_v0  ;;  %3178 = vmatprep.mubr.msk.bf16.mxu0 %vm3624_vm0, %v3623_v0 }
  0x40   :  { %3239 = vmatpush3.bf16.msra.mxu1 %v3617_v52  ;;  %v38_v52 = vld [vmem:[%s5369_s0 + $0xb8] sm:$0xff] }
  0x41   :  { %3362 = vmatprep.subr.bf16.mxu1 %v3623_v0  ;;  %v56_v55 = vpack.c.bf16 %v38_v52, %v37_v51  ;;  %v2689_v51 = vld [vmem:[%s5369_s0 + $0x270] sm:$0xff]  ;;  %v2690_v52 = vld [vmem:[%s5369_s0 + $0x278] sm:$0xff] }
  0x42   :  { %v838_v60 = vpack.c.bf16 %v2690_v52, %v2689_v51  ;;  %v2697_v51 = vld [vmem:[%s5369_s0 + $0x2b0] sm:$0xff]  ;;  %v2698_v52 = vld [vmem:[%s5369_s0 + $0x2b8] sm:$0xff] }
  0x46   :  { %3121 = vmatmul.mubr.msk.bf16.gmra.mrb[32].mxu1 %vm117_vm1, %v3824_v57  ;;  %3179 = vmatmul.mubr.msk.bf16.vlgmr.msra.gmra.mrb[32].mxu0 %vm117_vm1, %v550_v58  ;;  %v39_v58 = vld [vmem:[%s5369_s0 + $0xc0] sm:$0xff] }
  0x47   :  { %3301 = vmatpush3.bf16.msra.mxu0 %v3618_v59  ;;  %3124 = vmatprep.mubr.msk.bf16.mxu1 %vm3624_vm0, %v3623_v0  ;;  %v40_v59 = vld [vmem:[%s5369_s0 + $0xc8] sm:$0xff] }
  0x48   :  { %3182 = vmatprep.mubr.msk.bf16.mxu0 %vm3624_vm0, %v3623_v0  ;;  %3424 = vmatprep.subr.bf16.mxu0 %v3623_v0  ;;  %v57_v62 = vpack.c.bf16 %v40_v59, %v39_v58 }
  0x4e   :  { %3125 = vmatmul.mubr.msk.bf16.gmra.mrb[36].mxu1 %vm117_vm1, %v3849_v1  ;;  %3183 = vmatmul.mubr.msk.bf16.gmra.mrb[36].mxu0 %vm117_vm1, %v551_v2  ;;  %v41_v2 = vld [vmem:[%s5369_s0 + $0xd0] sm:$0xff] }
  0x4f   :  { %3128 = vmatprep.mubr.msk.bf16.mxu1 %vm3624_vm0, %v3623_v0  ;;  %3186 = vmatprep.mubr.msk.bf16.mxu0 %vm3624_vm0, %v3623_v0  ;;  %v58_v6 = vpack.c.bf16 %v42_v3, %v41_v2 }
  0x56   :  { %3129 = vmatmul.mubr.msk.bf16.gmra.mrb[40].mxu1 %vm117_vm1, %v3870_v7  ;;  %3187 = vmatmul.mubr.msk.bf16.gmra.mrb[40].mxu0 %vm117_vm1, %v552_v8  ;;  %v562_v8 = vpack.c.bf16 %v545_v5, %v544_v4  ;;  %v2691_v4 = vld [vmem:[%s5369_s0 + $0x280] sm:$0xff]  ;;  %v2692_v5 = vld [vmem:[%s5369_s0 + $0x288] sm:$0xff] }
  0x57   :  { %3132 = vmatprep.mubr.msk.bf16.mxu1 %vm3624_vm0, %v3623_v0  ;;  %3190 = vmatprep.mubr.msk.bf16.mxu0 %vm3624_vm0, %v3623_v0 }
  0x5e   :  { %3133 = vmatmul.mubr.msk.bf16.gmra.mrb[44].mxu1 %vm117_vm1, %v3891_v13  ;;  %3191 = vmatmul.mubr.msk.bf16.gmra.mrb[44].mxu0 %vm117_vm1, %v553_v14  ;;  %v59_v14 = vpack.c.bf16 %v44_v10, %v43_v9 }
  0x5f   :  { %3136 = vmatprep.mubr.msk.bf16.mxu1 %vm3624_vm0, %v3623_v0  ;;  %3194 = vmatprep.mubr.msk.bf16.mxu0 %vm3624_vm0, %v3623_v0 }
  0x66   :  { %3137 = vmatmul.mubr.msk.bf16.gmra.mrb[48].mxu1 %vm117_vm1, %v3912_v19  ;;  %3195 = vmatmul.mubr.msk.bf16.gmra.mrb[48].mxu0 %vm117_vm1, %v554_v20  ;;  %v2680_v20 = vld [vmem:[%s5369_s0 + $0x228] sm:$0xff] }
  0x67   :  { %3140 = vmatprep.mubr.msk.bf16.mxu1 %vm3624_vm0, %v3623_v0  ;;  %3198 = vmatprep.mubr.msk.bf16.mxu0 %vm3624_vm0, %v3623_v0  ;;  %v833_v22 = vpack.c.bf16 %v2680_v20, %v2679_v18 }
  0x6e   :  { %3141 = vmatmul.mubr.msk.bf16.gmra.mrb[52].mxu1 %vm117_vm1, %v3933_v25  ;;  %3199 = vmatmul.mubr.msk.bf16.gmra.mrb[52].mxu0 %vm117_vm1, %v555_v26  ;;  %v2682_v26 = vld [vmem:[%s5369_s0 + $0x238] sm:$0xff] }
  0x6f   :  { %3144 = vmatprep.mubr.msk.bf16.mxu1 %vm3624_vm0, %v3623_v0  ;;  %3202 = vmatprep.mubr.msk.bf16.mxu0 %vm3624_vm0, %v3623_v0  ;;  %v834_v29 = vpack.c.bf16 %v2682_v26, %v2681_v24  ;;  %v2740_v24 = vld [vmem:[%s5369_s0 + $0x398] sm:$0xff] }
  0x76   :  { %3145 = vmatmul.mubr.msk.bf16.gmra.mrb[56].mxu1 %vm117_vm1, %v3954_v31  ;;  %3203 = vmatmul.mubr.msk.bf16.gmra.mrb[56].mxu0 %vm117_vm1, %v556_v32  ;;  %v3620_v32 = vld [vmem:[%s5368_s1 + $0x30] sm:$0xff]  }
  0x77   :  { %3148 = vmatprep.mubr.msk.bf16.mxu1 %vm3624_vm0, %v3623_v0  ;;  %3206 = vmatprep.mubr.msk.bf16.mxu0 %vm3624_vm0, %v3623_v0 }
  0x7e   :  { %3149 = vmatmul.mubr.msk.bf16.gmra.mrb[60].mxu1 %vm117_vm1, %v53_v37  ;;  %3207 = vmatmul.mubr.msk.bf16.gmra.mrb[60].mxu0 %vm117_vm1, %v557_v38  ;;  %v835_v37 = vpack.c.bf16 %v2684_v34, %v2683_v33  ;;  %v1117_v38 = vpack.c.bf16 %v2730_v36, %v2729_v35 }
  0x7f   :  { %3152 = vmatprep.mubr.msk.bf16.mxu1 %vm3624_vm0, %v3623_v0  ;;  %3210 = vmatprep.mubr.msk.bf16.mxu0 %vm3624_vm0, %v3623_v0 }
  0x86   :  { %3153 = vmatmul.mubr.msk.bf16.gmra.mrb[64].mxu1 %vm117_vm1, %v54_v43  ;;  %3211 = vmatmul.mubr.msk.bf16.gmra.mrb[64].mxu0 %vm117_vm1, %v558_v44  ;;  %v836_v43 = vpack.c.bf16 %v2686_v40, %v2685_v39  ;;  %v1118_v44 = vpack.c.bf16 %v2732_v42, %v2731_v41  ;;  %v2741_v39 = vld [vmem:[%s5369_s0 + $0x3a0] sm:$0xff]  ;;  %v2742_v40 = vld [vmem:[%s5369_s0 + $0x3a8] sm:$0xff] }
  0x87   :  { %3156 = vmatprep.mubr.msk.bf16.mxu1 %vm3624_vm0, %v3623_v0  ;;  %3214 = vmatprep.mubr.msk.bf16.mxu0 %vm3624_vm0, %v3623_v0 }
  0x8e   :  { %3157 = vmatmul.mubr.msk.bf16.gmra.mrb[68].mxu1 %vm117_vm1, %v55_v49  ;;  %3215 = vmatmul.mubr.msk.bf16.gmra.mrb[68].mxu0 %vm117_vm1, %v559_v50  ;;  %v837_v49 = vpack.c.bf16 %v2688_v46, %v2687_v45  ;;  %v1119_v50 = vpack.c.bf16 %v2734_v48, %v2733_v47  ;;  %v1123_v46 = vpack.c.bf16 %v2742_v40, %v2741_v39 }
  0x8f   :  { %3160 = vmatprep.mubr.msk.bf16.mxu1 %vm3624_vm0, %v3623_v0  ;;  %3218 = vmatprep.mubr.msk.bf16.mxu0 %vm3624_vm0, %v3623_v0 }
  0x96   :  { %3161 = vmatmul.mubr.msk.bf16.gmra.mrb[72].mxu1 %vm117_vm1, %v56_v55  ;;  %3219 = vmatmul.mubr.msk.bf16.gmra.mrb[72].mxu0 %vm117_vm1, %v560_v56 }
  0x97   :  { %3164 = vmatprep.mubr.msk.bf16.mxu1 %vm3624_vm0, %v3623_v0  ;;  %3222 = vmatprep.mubr.msk.bf16.mxu0 %vm3624_vm0, %v3623_v0 }
  0x9e   :  { %3165 = vmatmul.mubr.msk.bf16.gmra.mrb[76].mxu1 %vm117_vm1, %v57_v62  ;;  %3223 = vmatmul.mubr.msk.bf16.gmra.mrb[76].mxu0 %vm117_vm1, %v561_v63 }
  0x9f   :  { %3168 = vmatprep.mubr.msk.bf16.mxu1 %vm3624_vm0, %v3623_v0  ;;  %3226 = vmatprep.mubr.msk.bf16.mxu0 %vm3624_vm0, %v3623_v0 }
  0xa6   :  { %3169 = vmatmul.mubr.msk.bf16.gmra.mrb[80].mxu1 %vm117_vm1, %v58_v6  ;;  %3227 = vmatmul.mubr.msk.bf16.gmra.mrb[80].mxu0 %vm117_vm1, %v562_v8  ;;  %v2737_v6 = vld [vmem:[%s5369_s0 + $0x380] sm:$0xff]  ;;  %v2738_v8 = vld [vmem:[%s5369_s0 + $0x388] sm:$0xff] }
  0xa7   :  { %3172 = vmatprep.mubr.msk.bf16.mxu1 %vm3624_vm0, %v3623_v0  ;;  %3230 = vmatprep.mubr.msk.bf16.mxu0 %vm3624_vm0, %v3623_v0 }
  0xae   :  { %3173 = vmatmul.mubr.msk.bf16.gmra.mrb[84].mxu1 %vm117_vm1, %v59_v14  ;;  %3231 = vmatmul.mubr.msk.bf16.gmra.mrb[84].mxu0 %vm117_vm1, %v563_v15  ;;  %v839_v14 = vpack.c.bf16 %v2692_v5, %v2691_v4  ;;  %v1121_v15 = vpack.c.bf16 %v2738_v8, %v2737_v6 }
  0xaf   :  { %3234 = vmatprep.mubr.msk.bf16.mxu0 %vm3624_vm0, %v3623_v0  ;;  %3240 = vmatprep.mubr.msk.bf16.mxu1 %vm3624_vm0, %v3623_v0 }
  0xb6   :  { %3235 = vmatmul.mubr.msk.bf16.gmra.mrb[88].mxu0 %vm117_vm1, %v564_v21  ;;  %3241 = vmatmul.mubr.msk.bf16.vlgmr.msra.gmra.mrb[88].mxu1 %vm117_vm1, %v833_v22  ;;  %v2693_v21 = vld [vmem:[%s5369_s0 + $0x290] sm:$0xff]  ;;  %v2694_v22 = vld [vmem:[%s5369_s0 + $0x298] sm:$0xff] }
  0xb7   :  { %3244 = vmatprep.mubr.msk.bf16.mxu1 %vm3624_vm0, %v3623_v0  ;;  %3302 = vmatprep.mubr.msk.bf16.mxu0 %vm3624_vm0, %v3623_v0 }
  0xb8   :  { %3363 = vmatpush3.bf16.msra.mxu1 %v3619_v23  ;;  %v2739_v23 = vld [vmem:[%s5369_s0 + $0x390] sm:$0xff] }
  0xb9   :  { %3486 = vmatprep.subr.bf16.mxu1 %v3623_v0 }
  0xbe   :  { %3245 = vmatmul.mubr.msk.bf16.gmra.mrb[92].mxu1 %vm117_vm1, %v834_v29  ;;  %3303 = vmatmul.mubr.msk.bf16.vlgmr.msra.gmra.mrb[92].mxu0 %vm117_vm1, %v1116_v30  ;;  %v840_v30 = vpack.c.bf16 %v2694_v22, %v2693_v21 }
  0xbf   :  { %3425 = vmatpush3.bf16.msra.mxu0 %v3620_v32  ;;  %3248 = vmatprep.mubr.msk.bf16.mxu1 %vm3624_vm0, %v3623_v0  ;;  %v1122_v32 = vpack.c.bf16 %v2740_v24, %v2739_v23 }
  0xc0   :  { %3306 = vmatprep.mubr.msk.bf16.mxu0 %vm3624_vm0, %v3623_v0  ;;  %3548 = vmatprep.subr.bf16.mxu0 %v3623_v0 }
  0xc6   :  { %3249 = vmatmul.mubr.msk.bf16.gmra.mrb[96].mxu1 %vm117_vm1, %v835_v37  ;;  %3307 = vmatmul.mubr.msk.bf16.gmra.mrb[96].mxu0 %vm117_vm1, %v1117_v38  ;;  %v2695_v37 = vld [vmem:[%s5369_s0 + $0x2a0] sm:$0xff]  ;;  %v2696_v38 = vld [vmem:[%s5369_s0 + $0x2a8] sm:$0xff] }
  0xc7   :  { %3252 = vmatprep.mubr.msk.bf16.mxu1 %vm3624_vm0, %v3623_v0  ;;  %3310 = vmatprep.mubr.msk.bf16.mxu0 %vm3624_vm0, %v3623_v0  ;;  %v841_v45 = vpack.c.bf16 %v2696_v38, %v2695_v37  ;;  %v2747_v37 = vld [vmem:[%s5369_s0 + $0x3d0] sm:$0xff]  ;;  %v2748_v38 = vld [vmem:[%s5369_s0 + $0x3d8] sm:$0xff] }
  0xce   :  { %3253 = vmatmul.mubr.msk.bf16.gmra.mrb[100].mxu1 %vm117_vm1, %v836_v43  ;;  %3311 = vmatmul.mubr.msk.bf16.gmra.mrb[100].mxu0 %vm117_vm1, %v1118_v44 }
  0xcf   :  { %3256 = vmatprep.mubr.msk.bf16.mxu1 %vm3624_vm0, %v3623_v0  ;;  %3314 = vmatprep.mubr.msk.bf16.mxu0 %vm3624_vm0, %v3623_v0 }
  0xd6   :  { %3257 = vmatmul.mubr.msk.bf16.gmra.mrb[104].mxu1 %vm117_vm1, %v837_v49  ;;  %3315 = vmatmul.mubr.msk.bf16.gmra.mrb[104].mxu0 %vm117_vm1, %v1119_v50 }
  0xd7   :  { %3260 = vmatprep.mubr.msk.bf16.mxu1 %vm3624_vm0, %v3623_v0  ;;  %3318 = vmatprep.mubr.msk.bf16.mxu0 %vm3624_vm0, %v3623_v0 }
  0xd9   :  { %v4199_v55 = vpop.f32.mrb[0].mxu0  ;;  %v4201_v56 = vpop.f32.mrb[0].mxu1 }
  0xda   :  { %v3056_v58 = vpop.f32.mrb[1].mxu0  ;;  %v3088_v59 = vpop.f32.mrb[1].mxu1 }
  0xdb   :  { %v4203_v62 = vpop.f32.mrb[2].mxu0  ;;  %v4205_v63 = vpop.f32.mrb[2].mxu1 }
  0xdc   :  { %v3057_v2 = vpop.f32.mrb[3].mxu0  ;;  %v3089_v3 = vpop.f32.mrb[3].mxu1 }
  0xdd   :  { %v842_v2 = vpack.c.bf16 %v2698_v52, %v2697_v51  ;;  %v1124_v3 = vpack.c.bf16 %v2744_v54, %v2743_v53  ;;  %v2703_v53 = vld [vmem:[%s5369_s0 + $0x2e0] sm:$0xff]  ;;  %v2704_v54 = vld [vmem:[%s5369_s0 + $0x2e8] sm:$0xff] }
  0xde   :  { %3261 = vmatmul.mubr.msk.bf16.gmra.mrb[108].mxu1 %vm117_vm1, %v838_v60  ;;  %3319 = vmatmul.mubr.msk.bf16.gmra.mrb[108].mxu0 %vm117_vm1, %v1120_v61 }
  0xdf   :  { %3264 = vmatprep.mubr.msk.bf16.mxu1 %vm3624_vm0, %v3623_v0  ;;  %3322 = vmatprep.mubr.msk.bf16.mxu0 %vm3624_vm0, %v3623_v0 }
  0xe1   :  { %v4225_v9 = vpop.f32.mrb[4].mxu0  ;;  %v4227_v10 = vpop.f32.mrb[4].mxu1 }
  0xe2   :  { %v3060_v11 = vpop.f32.mrb[5].mxu0  ;;  %v3092_v12 = vpop.f32.mrb[5].mxu1 }
  0xe3   :  { %v4229_v16 = vpop.f32.mrb[6].mxu0  ;;  %v4231_v17 = vpop.f32.mrb[6].mxu1  ;;  %v2699_v11 = vld [vmem:[%s5369_s0 + $0x2c0] sm:$0xff]  ;;  %v2700_v12 = vld [vmem:[%s5369_s0 + $0x2c8] sm:$0xff] }
  0xe4   :  { %v3061_v18 = vpop.f32.mrb[7].mxu0  ;;  %v3093_v20 = vpop.f32.mrb[7].mxu1  ;;  %v843_v23 = vpack.c.bf16 %v2700_v12, %v2699_v11  ;;  %v845_v12 = vpack.c.bf16 %v2704_v54, %v2703_v53 }
  0xe6   :  { %3265 = vmatmul.mubr.msk.bf16.gmra.mrb[112].mxu1 %vm117_vm1, %v839_v14  ;;  %3323 = vmatmul.mubr.msk.bf16.gmra.mrb[112].mxu0 %vm117_vm1, %v1121_v15  ;;  %v2745_v14 = vld [vmem:[%s5369_s0 + $0x3c0] sm:$0xff]  ;;  %v2746_v15 = vld [vmem:[%s5369_s0 + $0x3c8] sm:$0xff] }
  0xe7   :  { %3268 = vmatprep.mubr.msk.bf16.mxu1 %vm3624_vm0, %v3623_v0  ;;  %3326 = vmatprep.mubr.msk.bf16.mxu0 %vm3624_vm0, %v3623_v0  ;;  %v1125_v24 = vpack.c.bf16 %v2746_v15, %v2745_v14 }
  0xe9   :  { %v4251_v26 = vpop.f32.mrb[8].mxu0  ;;  %v4253_v27 = vpop.f32.mrb[8].mxu1 }
  0xea   :  { %v3064_v28 = vpop.f32.mrb[9].mxu0  ;;  %v3096_v29 = vpop.f32.mrb[9].mxu1 }
  0xeb   :  { %v4255_v33 = vpop.f32.mrb[10].mxu0  ;;  %v4257_v34 = vpop.f32.mrb[10].mxu1 }
  0xec   :  { %v3065_v35 = vpop.f32.mrb[11].mxu0  ;;  %v3097_v36 = vpop.f32.mrb[11].mxu1 }
  0xed   :  { %v2701_v35 = vld [vmem:[%s5369_s0 + $0x2d0] sm:$0xff]  ;;  %v2702_v36 = vld [vmem:[%s5369_s0 + $0x2d8] sm:$0xff] }
  0xee   :  { %3269 = vmatmul.mubr.msk.bf16.gmra.mrb[116].mxu1 %vm117_vm1, %v840_v30  ;;  %3327 = vmatmul.mubr.msk.bf16.gmra.mrb[116].mxu0 %vm117_vm1, %v1122_v32 }
  0xef   :  { %3272 = vmatprep.mubr.msk.bf16.mxu1 %vm3624_vm0, %v3623_v0  ;;  %3330 = vmatprep.mubr.msk.bf16.mxu0 %vm3624_vm0, %v3623_v0 }
  0xf1   :  { %v4277_v41 = vpop.f32.mrb[12].mxu0  ;;  %v4279_v42 = vpop.f32.mrb[12].mxu1 }
  0xf2   :  { %v3068_v43 = vpop.f32.mrb[13].mxu0  ;;  %v3100_v44 = vpop.f32.mrb[13].mxu1 }
  0xf3   :  { %v4281_v47 = vpop.f32.mrb[14].mxu0  ;;  %v4283_v48 = vpop.f32.mrb[14].mxu1 }
  0xf4   :  { %v3069_v49 = vpop.f32.mrb[15].mxu0  ;;  %v3101_v50 = vpop.f32.mrb[15].mxu1 }
  0xf6   :  { %3273 = vmatmul.mubr.msk.bf16.gmra.mrb[120].mxu1 %vm117_vm1, %v841_v45  ;;  %3331 = vmatmul.mubr.msk.bf16.gmra.mrb[120].mxu0 %vm117_vm1, %v1123_v46  ;;  %v844_v45 = vpack.c.bf16 %v2702_v36, %v2701_v35  ;;  %v1126_v46 = vpack.c.bf16 %v2748_v38, %v2747_v37 }
  0xf7   :  { %3276 = vmatprep.mubr.msk.bf16.mxu1 %vm3624_vm0, %v3623_v0  ;;  %3334 = vmatprep.mubr.msk.bf16.mxu0 %vm3624_vm0, %v3623_v0 }
  0xf9   :  { %v4303_v58 = vpop.f32.mrb[16].mxu0  ;;  %v4305_v59 = vpop.f32.mrb[16].mxu1 }
  0xfa   :  { %v3072_v60 = vpop.f32.mrb[17].mxu0  ;;  %v3104_v61 = vpop.f32.mrb[17].mxu1 }
  0xfb   :  { %v4307_v4 = vpop.f32.mrb[18].mxu0  ;;  %v4309_v5 = vpop.f32.mrb[18].mxu1  ;;  %v2749_v60 = vld [vmem:[%s5369_s0 + $0x3e0] sm:$0xff]  ;;  %v2750_v61 = vld [vmem:[%s5369_s0 + $0x3e8] sm:$0xff] }
  0xfc   :  { %v3073_v6 = vpop.f32.mrb[19].mxu0  ;;  %v3105_v8 = vpop.f32.mrb[19].mxu1  ;;  %v1127_v14 = vpack.c.bf16 %v2750_v61, %v2749_v60 }
  0xfe   :  { %3277 = vmatmul.mubr.msk.bf16.gmra.mrb[124].mxu1 %vm117_vm1, %v842_v2  ;;  %3335 = vmatmul.mubr.msk.bf16.gmra.mrb[124].mxu0 %vm117_vm1, %v1124_v3 }
  0xff   :  { %3280 = vmatprep.mubr.msk.bf16.mxu1 %vm3624_vm0, %v3623_v0  ;;  %3338 = vmatprep.mubr.msk.bf16.mxu0 %vm3624_vm0, %v3623_v0 }
 0x101   :  { %v4329_v18 = vpop.f32.mrb[20].mxu0  ;;  %v4331_v20 = vpop.f32.mrb[20].mxu1 }
 0x102   :  { %v3076_v21 = vpop.f32.mrb[21].mxu0  ;;  %v3108_v22 = vpop.f32.mrb[21].mxu1 }
 0x103   :  { %v4333_v28 = vpop.f32.mrb[22].mxu0  ;;  %v4335_v29 = vpop.f32.mrb[22].mxu1 }
 0x104   :  { %v3077_v30 = vpop.f32.mrb[23].mxu0  ;;  %v3109_v32 = vpop.f32.mrb[23].mxu1 }
 0x105   :  { %v2705_v30 = vld [vmem:[%s5369_s0 + $0x2f0] sm:$0xff]  ;;  %v2752_v32 = vld [vmem:[%s5369_s0 + $0x3f8] sm:$0xff] }
 0x106   :  { %3281 = vmatmul.mubr.msk.bf16.gmra.mrb[128].mxu1 %vm117_vm1, %v843_v23  ;;  %3339 = vmatmul.mubr.msk.bf16.gmra.mrb[128].mxu0 %vm117_vm1, %v1125_v24 }
 0x107   :  { %3284 = vmatprep.mubr.msk.bf16.mxu1 %vm3624_vm0, %v3623_v0  ;;  %3342 = vmatprep.mubr.msk.bf16.mxu0 %vm3624_vm0, %v3623_v0 }
 0x109   :  { %v4355_v39 = vpop.f32.mrb[24].mxu0  ;;  %v4357_v40 = vpop.f32.mrb[24].mxu1 }
 0x10a   :  { %v3080_v43 = vpop.f32.mrb[25].mxu0  ;;  %v3112_v44 = vpop.f32.mrb[25].mxu1 }
 0x10b   :  { %v4359_v49 = vpop.f32.mrb[26].mxu0  ;;  %v4361_v50 = vpop.f32.mrb[26].mxu1 }
 0x10c   :  { %v3081_v51 = vpop.f32.mrb[27].mxu0  ;;  %v3113_v52 = vpop.f32.mrb[27].mxu1 }
 0x10e   :  { %3285 = vmatmul.mubr.msk.bf16.gmra.mrb[132].mxu1 %vm117_vm1, %v844_v45  ;;  %3343 = vmatmul.mubr.msk.bf16.gmra.mrb[132].mxu0 %vm117_vm1, %v1126_v46 }
 0x10f   :  { %3288 = vmatprep.mubr.msk.bf16.mxu1 %vm3624_vm0, %v3623_v0  ;;  %3346 = vmatprep.mubr.msk.bf16.mxu0 %vm3624_vm0, %v3623_v0 }
 0x111   :  { %v4381_v2 = vpop.f32.mrb[28].mxu0  ;;  %v401_v3 = vpop.f32.mrb[28].mxu1 }
 0x112   :  { %v402_v6 = vadd.f32 %v401_v3, %v4199_v55  ;;  %v3084_v8 = vpop.f32.mrb[29].mxu0  ;;  %v3118_v11 = vpop.f32.mrb[29].mxu1  ;;  %v2706_v55 = vld [vmem:[%s5369_s0 + $0x2f8] sm:$0xff]  ;;  %v2753_v3 = vld [vmem:[%s5369_s0 + $0x400] sm:$0xff] }
 0x113   :  { %v4384_v15 = vpop.f32.mrb[30].mxu0  ;;  %v404_v21 = vpop.f32.mrb[30].mxu1  ;;  %v846_v45 = vpack.c.bf16 %v2706_v55, %v2705_v30 }
 0x114   :  { %v405_v22 = vadd.f32 %v404_v21, %v4203_v62  ;;  %v3085_v23 = vpop.f32.mrb[31].mxu0  ;;  %v3119_v24 = vpop.f32.mrb[31].mxu1  ;;  %v2751_v62 = vld [vmem:[%s5369_s0 + $0x3f0] sm:$0xff] }
 0x115   :  { %v1128_v46 = vpack.c.bf16 %v2752_v32, %v2751_v62 }
 0x116   :  { %3289 = vmatmul.mubr.msk.bf16.gmra.mrb[136].mxu1 %vm117_vm1, %v845_v12  ;;  %3347 = vmatmul.mubr.msk.bf16.gmra.mrb[136].mxu0 %vm117_vm1, %v1127_v14 }
 0x117   :  { %3292 = vmatprep.mubr.msk.bf16.mxu1 %vm3624_vm0, %v3623_v0  ;;  %3350 = vmatprep.mubr.msk.bf16.mxu0 %vm3624_vm0, %v3623_v0 }
 0x119   :  { %v409_v35 = vpop.f32.mrb[32].mxu1  ;;  %v653_v36 = vpop.f32.mrb[32].mxu0 }
 0x11a   :  { %v410_v37 = vadd.f32 %v409_v35, %v4225_v9  ;;  %v4406_v38 = vadd.f32 %v653_v36, %v402_v6  ;;  %v3122_v43 = vpop.f32.mrb[33].mxu1  ;;  %v3180_v44 = vpop.f32.mrb[33].mxu0  ;;  %v2707_v9 = vld [vmem:[%s5369_s0 + $0x300] sm:$0xff]  ;;  %v2754_v6 = vld [vmem:[%s5369_s0 + $0x408] sm:$0xff] }
 0x11b   :  { %v412_v51 = vpop.f32.mrb[34].mxu1  ;;  %v656_v52 = vpop.f32.mrb[34].mxu0  ;;  %v1129_v24 = vpack.c.bf16 %v2754_v6, %v2753_v3  ;;  %v2776_v43 = vld [vmem:[%s5369_s0 + $0x229] sm:$0xff] }
 0x11c   :  { %v413_v53 = vadd.f32 %v412_v51, %v4229_v16  ;;  %v4409_v54 = vadd.f32 %v656_v52, %v405_v22  ;;  %v3181_v60 = vpop.f32.mrb[35].mxu0  ;;  %v3123_v61 = vpop.f32.mrb[35].mxu1  ;;  %v2708_v16 = vld [vmem:[%s5369_s0 + $0x308] sm:$0xff] }
 0x11d   :  { %v847_v23 = vpack.c.bf16 %v2708_v16, %v2707_v9 }
 0x11e   :  { %3293 = vmatmul.mubr.msk.bf16.gmra.mrb[140].mxu1 %vm117_vm1, %v846_v45  ;;  %3351 = vmatmul.mubr.msk.bf16.gmra.mrb[140].mxu0 %vm117_vm1, %v1128_v46 }
 0x11f   :  { %3296 = vmatprep.mubr.msk.bf16.mxu1 %vm3624_vm0, %v3623_v0  ;;  %3354 = vmatprep.mubr.msk.bf16.mxu0 %vm3624_vm0, %v3623_v0 }
 0x121   :  { %v417_v8 = vpop.f32.mrb[36].mxu1  ;;  %v661_v11 = vpop.f32.mrb[36].mxu0 }
 0x122   :  { %v418_v12 = vadd.f32 %v417_v8, %v4251_v26  ;;  %v4430_v14 = vadd.f32 %v661_v11, %v410_v37  ;;  %v3126_v21 = vpop.f32.mrb[37].mxu1  ;;  %v3184_v22 = vpop.f32.mrb[37].mxu0  ;;  %v2755_v26 = vld [vmem:[%s5369_s0 + $0x410] sm:$0xff]  ;;  %v2775_v37 = vld [vmem:[%s5369_s0 + $0x221] sm:$0xff] }
 0x123   :  { %v420_v30 = vpop.f32.mrb[38].mxu1  ;;  %v664_v55 = vpop.f32.mrb[38].mxu0  ;;  %v1398_v61 = vpack.c.bf16 %v2776_v43, %v2775_v37  ;;  %v3621_v21 = vld [vmem:[%s5368_s1 + $0x38] sm:$0xff]  }
 0x124   :  { %v421_v62 = vadd.f32 %v420_v30, %v4255_v33  ;;  %v4433_v32 = vadd.f32 %v664_v55, %v413_v53  ;;  %v3185_v35 = vpop.f32.mrb[39].mxu0  ;;  %v3127_v36 = vpop.f32.mrb[39].mxu1  ;;  %v2756_v33 = vld [vmem:[%s5369_s0 + $0x418] sm:$0xff] }
 0x125   :  { %v1130_v60 = vpack.c.bf16 %v2756_v33, %v2755_v26  ;;  %v3622_v26 = vld [vmem:[%s5368_s1 + $0x40] sm:$0xff]  }
 0x126   :  { %3297 = vmatmul.mubr.msk.bf16.gmra.mrb[144].mxu1 %vm117_vm1, %v847_v23  ;;  %3355 = vmatmul.mubr.msk.bf16.gmra.mrb[144].mxu0 %vm117_vm1, %v1129_v24 }
 0x127   :  { %3358 = vmatprep.mubr.msk.bf16.mxu0 %vm3624_vm0, %v3623_v0  ;;  %3364 = vmatprep.mubr.msk.bf16.mxu1 %vm3624_vm0, %v3623_v0 }
 0x129   :  { %v425_v44 = vpop.f32.mrb[40].mxu1  ;;  %v669_v45 = vpop.f32.mrb[40].mxu0 }
 0x12a   :  { %v426_v46 = vadd.f32 %v425_v44, %v4277_v41  ;;  %v4454_v51 = vadd.f32 %v669_v45, %v418_v12  ;;  %v3130_v52 = vpop.f32.mrb[41].mxu1  ;;  %v3188_v53 = vpop.f32.mrb[41].mxu0  ;;  %v2777_v41 = vld [vmem:[%s5369_s0 + $0x231] sm:$0xff] }
 0x12b   :  { %v428_v9 = vpop.f32.mrb[42].mxu1  ;;  %v672_v16 = vpop.f32.mrb[42].mxu0 }
 0x12c   :  { %v429_v3 = vadd.f32 %v428_v9, %v4281_v47  ;;  %v4457_v6 = vadd.f32 %v672_v16, %v421_v62  ;;  %v3189_v8 = vpop.f32.mrb[43].mxu0  ;;  %v3131_v11 = vpop.f32.mrb[43].mxu1  ;;  %v2778_v47 = vld [vmem:[%s5369_s0 + $0x239] sm:$0xff] }
 0x12d   :  { %v1399_v62 = vpack.c.bf16 %v2778_v47, %v2777_v41 }
 0x12e   :  { %3359 = vmatmul.mubr.msk.bf16.gmra.mrb[148].mxu0 %vm117_vm1, %v1130_v60  ;;  %3365 = vmatmul.mubr.msk.bf16.vlgmr.msra.gmra.mrb[148].mxu1 %vm117_vm1, %v1398_v61 }
 0x12f   :  { %3368 = vmatprep.mubr.msk.bf16.mxu1 %vm3624_vm0, %v3623_v0  ;;  %3426 = vmatprep.mubr.msk.bf16.mxu0 %vm3624_vm0, %v3623_v0 }
 0x130   :  { %3487 = vmatpush3.bf16.msra.mxu1 %v3621_v21 }
 0x131   :  { %v433_v12 = vpop.f32.mrb[44].mxu1  ;;  %v677_v22 = vpop.f32.mrb[44].mxu0 }
 0x132   :  { %v434_v23 = vadd.f32 %v433_v12, %v4303_v58  ;;  %v4475_v24 = vadd.f32 %v677_v22, %v426_v46  ;;  %v3134_v30 = vpop.f32.mrb[45].mxu1  ;;  %v3192_v55 = vpop.f32.mrb[45].mxu0  ;;  %v2779_v58 = vld [vmem:[%s5369_s0 + $0x241] sm:$0xff] }
 0x133   :  { %v436_v35 = vpop.f32.mrb[46].mxu1  ;;  %v680_v36 = vpop.f32.mrb[46].mxu0 }
 0x134   :  { %v437_v33 = vadd.f32 %v436_v35, %v4307_v4  ;;  %v4481_v37 = vadd.f32 %v680_v36, %v429_v3  ;;  %v3193_v43 = vpop.f32.mrb[47].mxu0  ;;  %v3135_v44 = vpop.f32.mrb[47].mxu1  ;;  %v2780_v4 = vld [vmem:[%s5369_s0 + $0x249] sm:$0xff] }
 0x135   :  { %v1400_v61 = vpack.c.bf16 %v2780_v4, %v2779_v58 }
 0x136   :  { %3369 = vmatmul.mubr.msk.bf16.gmra.mrb[152].mxu1 %vm117_vm1, %v1399_v62  ;;  %3427 = vmatmul.mubr.msk.bf16.vlgmr.msra.gmra.mrb[152].mxu0 %vm117_vm1, %v3824_v57 }
 0x137   :  { %3549 = vmatpush3.bf16.msra.mxu0 %v3622_v26  ;;  %3372 = vmatprep.mubr.msk.bf16.mxu1 %vm3624_vm0, %v3623_v0 }
 0x138   :  { %3430 = vmatprep.mubr.msk.bf16.mxu0 %vm3624_vm0, %v3623_v0 }
 0x139   :  { %v441_v45 = vpop.f32.mrb[48].mxu1  ;;  %v685_v46 = vpop.f32.mrb[48].mxu0 }
 0x13a   :  { %v442_v52 = vadd.f32 %v441_v45, %v4329_v18  ;;  %v4497_v57 = vadd.f32 %v685_v46, %v434_v23  ;;  %v3138_v53 = vpop.f32.mrb[49].mxu1  ;;  %v3196_v60 = vpop.f32.mrb[49].mxu0  ;;  %v2781_v18 = vld [vmem:[%s5369_s0 + $0x251] sm:$0xff] }
 0x13b   :  { %v444_v9 = vpop.f32.mrb[50].mxu1  ;;  %v688_v16 = vpop.f32.mrb[50].mxu0 }
 0x13c   :  { %v445_v3 = vadd.f32 %v444_v9, %v4333_v28  ;;  %v4500_v8 = vadd.f32 %v688_v16, %v437_v33  ;;  %v3197_v11 = vpop.f32.mrb[51].mxu0  ;;  %v3139_v21 = vpop.f32.mrb[51].mxu1  ;;  %v2782_v28 = vld [vmem:[%s5369_s0 + $0x259] sm:$0xff] }
 0x13d   :  { %v1401_v30 = vpack.c.bf16 %v2782_v28, %v2781_v18 }
 0x13e   :  { %3373 = vmatmul.mubr.msk.bf16.gmra.mrb[156].mxu1 %vm117_vm1, %v1400_v61  ;;  %3431 = vmatmul.mubr.msk.bf16.gmra.mrb[156].mxu0 %vm117_vm1, %v3849_v1 }
 0x13f   :  { %3376 = vmatprep.mubr.msk.bf16.mxu1 %vm3624_vm0, %v3623_v0  ;;  %3434 = vmatprep.mubr.msk.bf16.mxu0 %vm3624_vm0, %v3623_v0 }
 0x141   :  { %v449_v41 = vpop.f32.mrb[52].mxu1  ;;  %v693_v47 = vpop.f32.mrb[52].mxu0 }
 0x142   :  { %v450_v12 = vadd.f32 %v449_v41, %v4355_v39  ;;  %v4516_v22 = vadd.f32 %v693_v47, %v442_v52  ;;  %v3142_v1 = vpop.f32.mrb[53].mxu1  ;;  %v3200_v23 = vpop.f32.mrb[53].mxu0  ;;  %v2783_v39 = vld [vmem:[%s5369_s0 + $0x261] sm:$0xff] }
 0x143   :  { %v452_v55 = vpop.f32.mrb[54].mxu1  ;;  %v696_v62 = vpop.f32.mrb[54].mxu0 }
 0x144   :  { %v453_v35 = vadd.f32 %v452_v55, %v4359_v49  ;;  %v4519_v36 = vadd.f32 %v696_v62, %v445_v3  ;;  %v3201_v26 = vpop.f32.mrb[55].mxu0  ;;  %v3143_v33 = vpop.f32.mrb[55].mxu1  ;;  %v2784_v49 = vld [vmem:[%s5369_s0 + $0x269] sm:$0xff] }
 0x145   :  { %v1402_v46 = vpack.c.bf16 %v2784_v49, %v2783_v39 }
 0x146   :  { %3377 = vmatmul.mubr.msk.bf16.gmra.mrb[160].mxu1 %vm117_vm1, %v1401_v30  ;;  %3435 = vmatmul.mubr.msk.bf16.gmra.mrb[160].mxu0 %vm117_vm1, %v3870_v7 }
 0x147   :  { %3380 = vmatprep.mubr.msk.bf16.mxu1 %vm3624_vm0, %v3623_v0  ;;  %3438 = vmatprep.mubr.msk.bf16.mxu0 %vm3624_vm0, %v3623_v0 }
 0x149   :  { %v457_v43 = vpop.f32.mrb[56].mxu1  ;;  %v701_v44 = vpop.f32.mrb[56].mxu0 }
 0x14a   :  { %v458_v58 = vadd.f32 %v457_v43, %v4381_v2  ;;  %v4535_v4 = vadd.f32 %v701_v44, %v450_v12  ;;  %v3146_v7 = vpop.f32.mrb[57].mxu1  ;;  %v3204_v45 = vpop.f32.mrb[57].mxu0  ;;  %v2785_v2 = vld [vmem:[%s5369_s0 + $0x271] sm:$0xff] }
 0x14b   :  { %v460_v52 = vpop.f32.mrb[58].mxu1  ;;  %v704_v53 = vpop.f32.mrb[58].mxu0 }
 0x14c   :  { %v461_v60 = vadd.f32 %v460_v52, %v4384_v15  ;;  %v4538_v61 = vadd.f32 %v704_v53, %v453_v35  ;;  %v3205_v9 = vpop.f32.mrb[59].mxu0  ;;  %v3147_v16 = vpop.f32.mrb[59].mxu1  ;;  %v2786_v15 = vld [vmem:[%s5369_s0 + $0x279] sm:$0xff] }
 0x14d   :  { %v1403_v41 = vpack.c.bf16 %v2786_v15, %v2785_v2 }
 0x14e   :  { %3381 = vmatmul.mubr.msk.bf16.gmra.mrb[164].mxu1 %vm117_vm1, %v1402_v46  ;;  %3439 = vmatmul.mubr.msk.bf16.gmra.mrb[164].mxu0 %vm117_vm1, %v3891_v13 }
 0x14f   :  { %3384 = vmatprep.mubr.msk.bf16.mxu1 %vm3624_vm0, %v3623_v0  ;;  %3442 = vmatprep.mubr.msk.bf16.mxu0 %vm3624_vm0, %v3623_v0 }
 0x151   :  { %v465_v3 = vpop.f32.mrb[60].mxu1  ;;  %v709_v11 = vpop.f32.mrb[60].mxu0 }
 0x152   :  { %v466_v21 = vadd.f32 %v465_v3, %v4201_v56  ;;  %v4554_v18 = vadd.f32 %v709_v11, %v458_v58  ;;  %v3150_v13 = vpop.f32.mrb[61].mxu1  ;;  %v3208_v28 = vpop.f32.mrb[61].mxu0  ;;  %v2787_v56 = vld [vmem:[%s5369_s0 + $0x281] sm:$0xff] }
 0x153   :  { %v468_v47 = vpop.f32.mrb[62].mxu1  ;;  %v712_v12 = vpop.f32.mrb[62].mxu0 }
 0x154   :  { %v469_v1 = vadd.f32 %v468_v47, %v4205_v63  ;;  %v4557_v23 = vadd.f32 %v712_v12, %v461_v60  ;;  %v3209_v30 = vpop.f32.mrb[63].mxu0  ;;  %v3151_v55 = vpop.f32.mrb[63].mxu1  ;;  %v2788_v63 = vld [vmem:[%s5369_s0 + $0x289] sm:$0xff] }
 0x155   :  { %v1404_v49 = vpack.c.bf16 %v2788_v63, %v2787_v56 }
 0x156   :  { %3385 = vmatmul.mubr.msk.bf16.gmra.mrb[168].mxu1 %vm117_vm1, %v1403_v41  ;;  %3443 = vmatmul.mubr.msk.bf16.gmra.mrb[168].mxu0 %vm117_vm1, %v3912_v19  ;;  %v1664_v41 = vld [vmem:[%s5369_s0 + $0x80] sm:$0xff] }
 0x157   :  { %3388 = vmatprep.mubr.msk.bf16.mxu1 %vm3624_vm0, %v3623_v0  ;;  %3446 = vmatprep.mubr.msk.bf16.mxu0 %vm3624_vm0, %v3623_v0 }
 0x159   :  { %v473_v62 = vpop.f32.mrb[64].mxu1  ;;  %v717_v35 = vpop.f32.mrb[64].mxu0 }
 0x15a   :  { %v474_v26 = vadd.f32 %v473_v62, %v4227_v10  ;;  %v4573_v33 = vadd.f32 %v717_v35, %v466_v21  ;;  %v3154_v19 = vpop.f32.mrb[65].mxu1  ;;  %v3212_v39 = vpop.f32.mrb[65].mxu0  ;;  %v2789_v10 = vld [vmem:[%s5369_s0 + $0x291] sm:$0xff] }
 0x15b   :  { %v476_v43 = vpop.f32.mrb[66].mxu1  ;;  %v720_v44 = vpop.f32.mrb[66].mxu0 }
 0x15c   :  { %v477_v58 = vadd.f32 %v476_v43, %v4231_v17  ;;  %v4576_v7 = vadd.f32 %v720_v44, %v469_v1  ;;  %v3213_v45 = vpop.f32.mrb[67].mxu0  ;;  %v3155_v46 = vpop.f32.mrb[67].mxu1  ;;  %v2790_v17 = vld [vmem:[%s5369_s0 + $0x299] sm:$0xff]  ;;  %v1666_v44 = vld [vmem:[%s5369_s0 + $0x90] sm:$0xff] }
 0x15d   :  { %v1405_v2 = vpack.c.bf16 %v2790_v17, %v2789_v10 }
 0x15e   :  { %3389 = vmatmul.mubr.msk.bf16.gmra.mrb[172].mxu1 %vm117_vm1, %v1404_v49  ;;  %3447 = vmatmul.mubr.msk.bf16.gmra.mrb[172].mxu0 %vm117_vm1, %v3933_v25 }
 0x15f   :  { %3392 = vmatprep.mubr.msk.bf16.mxu1 %vm3624_vm0, %v3623_v0  ;;  %3450 = vmatprep.mubr.msk.bf16.mxu0 %vm3624_vm0, %v3623_v0 }
 0x161   :  { %v481_v52 = vpop.f32.mrb[68].mxu1  ;;  %v725_v53 = vpop.f32.mrb[68].mxu0 }
 0x162   :  { %v482_v60 = vadd.f32 %v481_v52, %v4253_v27  ;;  %v4592_v9 = vadd.f32 %v725_v53, %v474_v26  ;;  %v3158_v25 = vpop.f32.mrb[69].mxu1  ;;  %v3216_v16 = vpop.f32.mrb[69].mxu0  ;;  %v2791_v27 = vld [vmem:[%s5369_s0 + $0x2a1] sm:$0xff] }
 0x163   :  { %v484_v15 = vpop.f32.mrb[70].mxu1  ;;  %v728_v3 = vpop.f32.mrb[70].mxu0 }
 0x164   :  { %v485_v11 = vadd.f32 %v484_v15, %v4257_v34  ;;  %v4595_v21 = vadd.f32 %v728_v3, %v477_v58  ;;  %v3217_v13 = vpop.f32.mrb[71].mxu0  ;;  %v3159_v28 = vpop.f32.mrb[71].mxu1  ;;  %v2792_v34 = vld [vmem:[%s5369_s0 + $0x2a9] sm:$0xff]  ;;  %v1667_v58 = vld [vmem:[%s5369_s0 + $0x98] sm:$0xff] }
 0x165   :  { %v1406_v63 = vpack.c.bf16 %v2792_v34, %v2791_v27  ;;  %v1688_v25 = vpack.c.bf16 %v1667_v58, %v1666_v44  ;;  %v1668_v28 = vld [vmem:[%s5369_s0 + $0xa0] sm:$0xff]  ;;  %v1669_v27 = vld [vmem:[%s5369_s0 + $0xa8] sm:$0xff] }
 0x166   :  { %3393 = vmatmul.mubr.msk.bf16.gmra.mrb[176].mxu1 %vm117_vm1, %v1405_v2  ;;  %3451 = vmatmul.mubr.msk.bf16.gmra.mrb[176].mxu0 %vm117_vm1, %v3954_v31  ;;  %v1665_v31 = vld [vmem:[%s5369_s0 + $0x88] sm:$0xff] }
 0x167   :  { %3396 = vmatprep.mubr.msk.bf16.mxu1 %vm3624_vm0, %v3623_v0  ;;  %3454 = vmatprep.mubr.msk.bf16.mxu0 %vm3624_vm0, %v3623_v0  ;;  %v1687_v62 = vpack.c.bf16 %v1665_v31, %v1664_v41 }
 0x169   :  { %v489_v47 = vpop.f32.mrb[72].mxu1  ;;  %v733_v12 = vpop.f32.mrb[72].mxu0 }
 0x16a   :  { %v490_v1 = vadd.f32 %v489_v47, %v4279_v42  ;;  %v4617_v30 = vadd.f32 %v733_v12, %v482_v60  ;;  %v3162_v55 = vpop.f32.mrb[73].mxu1  ;;  %v3220_v56 = vpop.f32.mrb[73].mxu0  ;;  %v2793_v42 = vld [vmem:[%s5369_s0 + $0x2b1] sm:$0xff] }
 0x16b   :  { %v492_v35 = vpop.f32.mrb[74].mxu1  ;;  %v736_v26 = vpop.f32.mrb[74].mxu0  ;;  %v1689_v56 = vpack.c.bf16 %v1669_v27, %v1668_v28 }
 0x16c   :  { %v493_v19 = vadd.f32 %v492_v35, %v4283_v48  ;;  %v4620_v39 = vadd.f32 %v736_v26, %v485_v11  ;;  %v3221_v49 = vpop.f32.mrb[75].mxu0  ;;  %v3163_v43 = vpop.f32.mrb[75].mxu1  ;;  %v2794_v48 = vld [vmem:[%s5369_s0 + $0x2b9] sm:$0xff] }
 0x16d   :  { %v1407_v60 = vpack.c.bf16 %v2794_v48, %v2793_v42  ;;  %v1670_v43 = vld [vmem:[%s5369_s0 + $0xb0] sm:$0xff]  ;;  %v1671_v42 = vld [vmem:[%s5369_s0 + $0xb8] sm:$0xff] }
 0x16e   :  { %3397 = vmatmul.mubr.msk.bf16.gmra.mrb[180].mxu1 %vm117_vm1, %v1406_v63  ;;  %3455 = vmatmul.mubr.msk.bf16.gmra.mrb[180].mxu0 %vm117_vm1, %v1687_v62 }
 0x16f   :  { %3400 = vmatprep.mubr.msk.bf16.mxu1 %vm3624_vm0, %v3623_v0  ;;  %3458 = vmatprep.mubr.msk.bf16.mxu0 %vm3624_vm0, %v3623_v0 }
 0x171   :  { %v497_v45 = vpop.f32.mrb[76].mxu1  ;;  %v741_v46 = vpop.f32.mrb[76].mxu0 }
 0x172   :  { %v498_v10 = vadd.f32 %v497_v45, %v4305_v59  ;;  %v4641_v17 = vadd.f32 %v741_v46, %v490_v1  ;;  %v3166_v52 = vpop.f32.mrb[77].mxu1  ;;  %v3224_v53 = vpop.f32.mrb[77].mxu0  ;;  %v2795_v59 = vld [vmem:[%s5369_s0 + $0x2c1] sm:$0xff] }
 0x173   :  { %v500_v16 = vpop.f32.mrb[78].mxu1  ;;  %v744_v2 = vpop.f32.mrb[78].mxu0  ;;  %v1690_v53 = vpack.c.bf16 %v1671_v42, %v1670_v43 }
 0x174   :  { %v501_v15 = vadd.f32 %v500_v16, %v4309_v5  ;;  %v4644_v3 = vadd.f32 %v744_v2, %v493_v19  ;;  %v3225_v11 = vpop.f32.mrb[79].mxu0  ;;  %v3167_v13 = vpop.f32.mrb[79].mxu1  ;;  %v2796_v5 = vld [vmem:[%s5369_s0 + $0x2c9] sm:$0xff] }
 0x175   :  { %v1408_v55 = vpack.c.bf16 %v2796_v5, %v2795_v59  ;;  %v1672_v13 = vld [vmem:[%s5369_s0 + $0xc0] sm:$0xff]  ;;  %v1673_v59 = vld [vmem:[%s5369_s0 + $0xc8] sm:$0xff] }
 0x176   :  { %3401 = vmatmul.mubr.msk.bf16.gmra.mrb[184].mxu1 %vm117_vm1, %v1407_v60  ;;  %3459 = vmatmul.mubr.msk.bf16.gmra.mrb[184].mxu0 %vm117_vm1, %v1688_v25 }
 0x177   :  { %3404 = vmatprep.mubr.msk.bf16.mxu1 %vm3624_vm0, %v3623_v0  ;;  %3462 = vmatprep.mubr.msk.bf16.mxu0 %vm3624_vm0, %v3623_v0 }
 0x179   :  { %v505_v34 = vpop.f32.mrb[80].mxu1  ;;  %v749_v41 = vpop.f32.mrb[80].mxu0 }
 0x17a   :  { %v506_v31 = vadd.f32 %v505_v34, %v4331_v20  ;;  %v4665_v47 = vadd.f32 %v749_v41, %v498_v10  ;;  %v3170_v12 = vpop.f32.mrb[81].mxu1  ;;  %v3228_v1 = vpop.f32.mrb[81].mxu0  ;;  %v2797_v20 = vld [vmem:[%s5369_s0 + $0x2d1] sm:$0xff] }
 0x17b   :  { %v508_v63 = vpop.f32.mrb[82].mxu1  ;;  %v752_v62 = vpop.f32.mrb[82].mxu0  ;;  %v1691_v1 = vpack.c.bf16 %v1673_v59, %v1672_v13 }
 0x17c   :  { %v509_v35 = vadd.f32 %v508_v63, %v4335_v29  ;;  %v4668_v26 = vadd.f32 %v752_v62, %v501_v15  ;;  %v3229_v19 = vpop.f32.mrb[83].mxu0  ;;  %v3171_v49 = vpop.f32.mrb[83].mxu1  ;;  %v2798_v29 = vld [vmem:[%s5369_s0 + $0x2d9] sm:$0xff] }
 0x17d   :  { %v1409_v52 = vpack.c.bf16 %v2798_v29, %v2797_v20  ;;  %v1674_v49 = vld [vmem:[%s5369_s0 + $0xd0] sm:$0xff]  ;;  %v1675_v20 = vld [vmem:[%s5369_s0 + $0xd8] sm:$0xff] }
 0x17e   :  { %3405 = vmatmul.mubr.msk.bf16.gmra.mrb[188].mxu1 %vm117_vm1, %v1408_v55  ;;  %3463 = vmatmul.mubr.msk.bf16.gmra.mrb[188].mxu0 %vm117_vm1, %v1689_v56 }
 0x17f   :  { %3408 = vmatprep.mubr.msk.bf16.mxu1 %vm3624_vm0, %v3623_v0  ;;  %3466 = vmatprep.mubr.msk.bf16.mxu0 %vm3624_vm0, %v3623_v0 }
 0x181   :  { %v513_v48 = vpop.f32.mrb[84].mxu1  ;;  %v757_v44 = vpop.f32.mrb[84].mxu0 }
 0x182   :  { %v514_v58 = vadd.f32 %v513_v48, %v4357_v40  ;;  %v4689_v45 = vadd.f32 %v757_v44, %v506_v31  ;;  %v3174_v46 = vpop.f32.mrb[85].mxu1  ;;  %v3232_v10 = vpop.f32.mrb[85].mxu0  ;;  %v2799_v40 = vld [vmem:[%s5369_s0 + $0x2e1] sm:$0xff] }
 0x183   :  { %v516_v60 = vpop.f32.mrb[86].mxu1  ;;  %v760_v25 = vpop.f32.mrb[86].mxu0  ;;  %v1692_v10 = vpack.c.bf16 %v1675_v20, %v1674_v49 }
 0x184   :  { %v517_v16 = vadd.f32 %v516_v60, %v4361_v50  ;;  %v4692_v2 = vadd.f32 %v760_v25, %v509_v35  ;;  %v3233_v15 = vpop.f32.mrb[87].mxu0  ;;  %v3175_v11 = vpop.f32.mrb[87].mxu1  ;;  %v2800_v50 = vld [vmem:[%s5369_s0 + $0x2e9] sm:$0xff] }
 0x185   :  { %v1410_v12 = vpack.c.bf16 %v2800_v50, %v2799_v40  ;;  %v1676_v11 = vld [vmem:[%s5369_s0 + $0xe0] sm:$0xff]  ;;  %v1677_v40 = vld [vmem:[%s5369_s0 + $0xe8] sm:$0xff] }
 0x186   :  { %3409 = vmatmul.mubr.msk.bf16.gmra.mrb[192].mxu1 %vm117_vm1, %v1409_v52  ;;  %3467 = vmatmul.mubr.msk.bf16.gmra.mrb[192].mxu0 %vm117_vm1, %v1690_v53 }
 0x187   :  { %3412 = vmatprep.mubr.msk.bf16.mxu1 %vm3624_vm0, %v3623_v0  ;;  %3470 = vmatprep.mubr.msk.bf16.mxu0 %vm3624_vm0, %v3623_v0 }
 0x189   :  { %v765_v5 = vpop.f32.mrb[88].mxu0  ;;  %v936_v28 = vpop.f32.mrb[88].mxu1 }
 0x18a   :  { %v4712_v27 = vadd.f32 %v765_v5, %v514_v58  ;;  %v1055_v34 = vadd.f32 %v936_v28, %v4406_v38  ;;  %v3236_v41 = vpop.f32.mrb[89].mxu0  ;;  %v3242_v31 = vpop.f32.mrb[89].mxu1  ;;  %v2801_v38 = vld [vmem:[%s5369_s0 + $0x2f1] sm:$0xff] }
 0x18b   :  { %v768_v55 = vpop.f32.mrb[90].mxu0  ;;  %v939_v56 = vpop.f32.mrb[90].mxu1  ;;  %v1693_v31 = vpack.c.bf16 %v1677_v40, %v1676_v11 }
 0x18c   :  { %v4715_v63 = vadd.f32 %v768_v55, %v517_v16  ;;  %v1056_v62 = vadd.f32 %v939_v56, %v4409_v54  ;;  %v3237_v35 = vpop.f32.mrb[91].mxu0  ;;  %v3243_v19 = vpop.f32.mrb[91].mxu1  ;;  %v2802_v54 = vld [vmem:[%s5369_s0 + $0x2f9] sm:$0xff] }
 0x18d   :  { %v1411_v46 = vpack.c.bf16 %v2802_v54, %v2801_v38  ;;  %v2841_v19 = vld [vmem:[%s5369_s0 + $0x120] sm:$0xff]  ;;  %v2842_v38 = vld [vmem:[%s5369_s0 + $0x128] sm:$0xff] }
 0x18e   :  { %3413 = vmatmul.mubr.msk.bf16.gmra.mrb[196].mxu1 %vm117_vm1, %v1410_v12  ;;  %3471 = vmatmul.mubr.msk.bf16.gmra.mrb[196].mxu0 %vm117_vm1, %v1691_v1 }
 0x18f   :  { %3416 = vmatprep.mubr.msk.bf16.mxu1 %vm3624_vm0, %v3623_v0  ;;  %3474 = vmatprep.mubr.msk.bf16.mxu0 %vm3624_vm0, %v3623_v0 }
 0x191   :  { %v944_v29 = vpop.f32.mrb[92].mxu1  ;;  %v1219_v43 = vpop.f32.mrb[92].mxu0 }
 0x192   :  { %v1057_v42 = vadd.f32 %v944_v29, %v4430_v14  ;;  %v4737_v48 = vadd.f32 %v1219_v43, %v1055_v34  ;;  %v3246_v44 = vpop.f32.mrb[93].mxu1  ;;  %v3304_v58 = vpop.f32.mrb[93].mxu0  ;;  %v2803_v14 = vld [vmem:[%s5369_s0 + $0x301] sm:$0xff] }
 0x193   :  { %v947_v52 = vpop.f32.mrb[94].mxu1  ;;  %v1222_v53 = vpop.f32.mrb[94].mxu0  ;;  %v1962_v58 = vpack.c.bf16 %v2842_v38, %v2841_v19 }
 0x194   :  { %v1058_v60 = vadd.f32 %v947_v52, %v4433_v32  ;;  %v4740_v25 = vadd.f32 %v1222_v53, %v1056_v62  ;;  %v3305_v16 = vpop.f32.mrb[95].mxu0  ;;  %v3247_v15 = vpop.f32.mrb[95].mxu1  ;;  %v2804_v32 = vld [vmem:[%s5369_s0 + $0x309] sm:$0xff] }
 0x195   :  { %v1412_v41 = vpack.c.bf16 %v2804_v32, %v2803_v14  ;;  %v2214_v15 = vld [vmem:[%s5369_s0 + $0x11] sm:$0xff]  ;;  %v2215_v14 = vld [vmem:[%s5369_s0 + $0x19] sm:$0xff] }
 0x196   :  { %3417 = vmatmul.mubr.msk.bf16.gmra.mrb[200].mxu1 %vm117_vm1, %v1411_v46  ;;  %3475 = vmatmul.mubr.msk.bf16.gmra.mrb[200].mxu0 %vm117_vm1, %v1692_v10 }
 0x197   :  { %3420 = vmatprep.mubr.msk.bf16.mxu1 %vm3624_vm0, %v3623_v0  ;;  %3478 = vmatprep.mubr.msk.bf16.mxu0 %vm3624_vm0, %v3623_v0 }
 0x199   :  { %v952_v50 = vpop.f32.mrb[96].mxu1  ;;  %v1227_v13 = vpop.f32.mrb[96].mxu0 }
 0x19a   :  { %v1059_v59 = vadd.f32 %v952_v50, %v4454_v51  ;;  %v4761_v5 = vadd.f32 %v1227_v13, %v1057_v42  ;;  %v3250_v28 = vpop.f32.mrb[97].mxu1  ;;  %v3308_v34 = vpop.f32.mrb[97].mxu0  ;;  %v1678_v51 = vld [vmem:[%s5369_s0 + $0xf0] sm:$0xff] }
 0x19b   :  { %v955_v12 = vpop.f32.mrb[98].mxu1  ;;  %v1230_v1 = vpop.f32.mrb[98].mxu0  ;;  %v2244_v34 = vpack.c.bf16 %v2215_v14, %v2214_v15 }
 0x19c   :  { %v1060_v55 = vadd.f32 %v955_v12, %v4457_v6  ;;  %v4764_v56 = vadd.f32 %v1230_v1, %v1058_v60  ;;  %v3309_v62 = vpop.f32.mrb[99].mxu0  ;;  %v3251_v35 = vpop.f32.mrb[99].mxu1  ;;  %v1679_v6 = vld [vmem:[%s5369_s0 + $0xf8] sm:$0xff] }
 0x19d   :  { %v1694_v44 = vpack.c.bf16 %v1679_v6, %v1678_v51  ;;  %v2216_v35 = vld [vmem:[%s5369_s0 + $0x21] sm:$0xff]  ;;  %v2217_v51 = vld [vmem:[%s5369_s0 + $0x29] sm:$0xff] }
 0x19e   :  { %3421 = vmatmul.mubr.msk.bf16.gmra.mrb[204].mxu1 %vm117_vm1, %v1412_v41  ;;  %3479 = vmatmul.mubr.msk.bf16.gmra.mrb[204].mxu0 %vm117_vm1, %v1693_v31 }
 0x19f   :  { %3482 = vmatprep.mubr.msk.bf16.mxu0 %vm3624_vm0, %v3623_v0  ;;  %3488 = vmatprep.mubr.msk.bf16.mxu1 %vm3624_vm0, %v3623_v0 }
 0x1a1   :  { %v960_v54 = vpop.f32.mrb[100].mxu1  ;;  %v1235_v49 = vpop.f32.mrb[100].mxu0 }
 0x1a2   :  { %v1061_v20 = vadd.f32 %v960_v54, %v4475_v24  ;;  %v4785_v29 = vadd.f32 %v1235_v49, %v1059_v59  ;;  %v3254_v43 = vpop.f32.mrb[101].mxu1  ;;  %v3312_v42 = vpop.f32.mrb[101].mxu0  ;;  %v2843_v24 = vld [vmem:[%s5369_s0 + $0x130] sm:$0xff] }
 0x1a3   :  { %v963_v46 = vpop.f32.mrb[102].mxu1  ;;  %v1238_v10 = vpop.f32.mrb[102].mxu0  ;;  %v2245_v42 = vpack.c.bf16 %v2217_v51, %v2216_v35 }
 0x1a4   :  { %v1062_v52 = vadd.f32 %v963_v46, %v4481_v37  ;;  %v4788_v53 = vadd.f32 %v1238_v10, %v1060_v55  ;;  %v3313_v60 = vpop.f32.mrb[103].mxu0  ;;  %v3255_v16 = vpop.f32.mrb[103].mxu1  ;;  %v2844_v37 = vld [vmem:[%s5369_s0 + $0x138] sm:$0xff] }
 0x1a5   :  { %v1963_v28 = vpack.c.bf16 %v2844_v37, %v2843_v24  ;;  %v2218_v16 = vld [vmem:[%s5369_s0 + $0x31] sm:$0xff]  ;;  %v2219_v24 = vld [vmem:[%s5369_s0 + $0x39] sm:$0xff] }
 0x1a6   :  { %3483 = vmatmul.mubr.msk.bf16.gmra.mrb[208].mxu0 %vm117_vm1, %v1694_v44  ;;  %3489 = vmatmul.mubr.msk.bf16.vlgmr.msra.gmra.mrb[208].mxu1 %vm117_vm1, %v1962_v58 }
 0x1a7   :  { %3492 = vmatprep.mubr.msk.bf16.mxu1 %vm3624_vm0, %v3623_v0  ;;  %3550 = vmatprep.mubr.msk.bf16.mxu0 %vm3624_vm0, %v3623_v0 }
 0x1a9   :  { %v968_v32 = vpop.f32.mrb[104].mxu1  ;;  %v1243_v11 = vpop.f32.mrb[104].mxu0 }
 0x1aa   :  { %v1063_v40 = vadd.f32 %v968_v32, %v4497_v57  ;;  %v4809_v50 = vadd.f32 %v1243_v11, %v1061_v20  ;;  %v3258_v13 = vpop.f32.mrb[105].mxu1  ;;  %v3316_v59 = vpop.f32.mrb[105].mxu0  ;;  %v2845_v57 = vld [vmem:[%s5369_s0 + $0x140] sm:$0xff] }
 0x1ab   :  { %v971_v41 = vpop.f32.mrb[106].mxu1  ;;  %v1246_v31 = vpop.f32.mrb[106].mxu0  ;;  %v2246_v59 = vpack.c.bf16 %v2219_v24, %v2218_v16 }
 0x1ac   :  { %v1064_v12 = vadd.f32 %v971_v41, %v4500_v8  ;;  %v4812_v1 = vadd.f32 %v1246_v31, %v1062_v52  ;;  %v3317_v55 = vpop.f32.mrb[107].mxu0  ;;  %v3259_v62 = vpop.f32.mrb[107].mxu1  ;;  %v2846_v8 = vld [vmem:[%s5369_s0 + $0x148] sm:$0xff] }
 0x1ad   :  { %v1964_v43 = vpack.c.bf16 %v2846_v8, %v2845_v57  ;;  %v2220_v62 = vld [vmem:[%s5369_s0 + $0x41] sm:$0xff]  ;;  %v2221_v57 = vld [vmem:[%s5369_s0 + $0x49] sm:$0xff] }
 0x1ae   :  { %3493 = vmatmul.mubr.msk.bf16.gmra.mrb[212].mxu1 %vm117_vm1, %v1963_v28  ;;  %3551 = vmatmul.mubr.msk.bf16.vlgmr.msra.gmra.mrb[212].mxu0 %vm117_vm1, %v2244_v34 }
 0x1af   :  { %3496 = vmatprep.mubr.msk.bf16.mxu1 %vm3624_vm0, %v3623_v0  ;;  %3554 = vmatprep.mubr.msk.bf16.mxu0 %vm3624_vm0, %v3623_v0 }
 0x1b1   :  { %v976_v6 = vpop.f32.mrb[108].mxu1  ;;  %v1251_v19 = vpop.f32.mrb[108].mxu0 }
 0x1b2   :  { %v1065_v38 = vadd.f32 %v976_v6, %v4516_v22  ;;  %v4833_v54 = vadd.f32 %v1251_v19, %v1063_v40  ;;  %v3262_v49 = vpop.f32.mrb[109].mxu1  ;;  %v3320_v20 = vpop.f32.mrb[109].mxu0  ;;  %v2847_v22 = vld [vmem:[%s5369_s0 + $0x150] sm:$0xff] }
 0x1b3   :  { %v979_v44 = vpop.f32.mrb[110].mxu1  ;;  %v1254_v58 = vpop.f32.mrb[110].mxu0  ;;  %v2247_v20 = vpack.c.bf16 %v2221_v57, %v2220_v62 }
 0x1b4   :  { %v1066_v46 = vadd.f32 %v979_v44, %v4519_v36  ;;  %v4836_v10 = vadd.f32 %v1254_v58, %v1064_v12  ;;  %v3321_v52 = vpop.f32.mrb[111].mxu0  ;;  %v3263_v60 = vpop.f32.mrb[111].mxu1  ;;  %v2848_v36 = vld [vmem:[%s5369_s0 + $0x158] sm:$0xff] }
 0x1b5   :  { %v1965_v13 = vpack.c.bf16 %v2848_v36, %v2847_v22  ;;  %v2222_v60 = vld [vmem:[%s5369_s0 + $0x51] sm:$0xff]  ;;  %v2223_v22 = vld [vmem:[%s5369_s0 + $0x59] sm:$0xff] }
 0x1b6   :  { %3497 = vmatmul.mubr.msk.bf16.gmra.mrb[216].mxu1 %vm117_vm1, %v1964_v43  ;;  %3555 = vmatmul.mubr.msk.bf16.gmra.mrb[216].mxu0 %vm117_vm1, %v2245_v42 }
 0x1b7   :  { %3500 = vmatprep.mubr.msk.bf16.mxu1 %vm3624_vm0, %v3623_v0  ;;  %3558 = vmatprep.mubr.msk.bf16.mxu0 %vm3624_vm0, %v3623_v0 }
 0x1b9   :  { %v984_v37 = vpop.f32.mrb[112].mxu1  ;;  %v1259_v15 = vpop.f32.mrb[112].mxu0 }
 0x1ba   :  { %v1067_v14 = vadd.f32 %v984_v37, %v4535_v4  ;;  %v4857_v32 = vadd.f32 %v1259_v15, %v1065_v38  ;;  %v3266_v11 = vpop.f32.mrb[113].mxu1  ;;  %v3324_v40 = vpop.f32.mrb[113].mxu0  ;;  %v2849_v4 = vld [vmem:[%s5369_s0 + $0x160] sm:$0xff] }
 0x1bb   :  { %v987_v28 = vpop.f32.mrb[114].mxu1  ;;  %v1262_v34 = vpop.f32.mrb[114].mxu0  ;;  %v2248_v40 = vpack.c.bf16 %v2223_v22, %v2222_v60 }
 0x1bc   :  { %v1068_v41 = vadd.f32 %v987_v28, %v4538_v61  ;;  %v4860_v31 = vadd.f32 %v1262_v34, %v1066_v46  ;;  %v3325_v12 = vpop.f32.mrb[115].mxu0  ;;  %v3267_v55 = vpop.f32.mrb[115].mxu1  ;;  %v2850_v61 = vld [vmem:[%s5369_s0 + $0x168] sm:$0xff] }
 0x1bd   :  { %v1966_v49 = vpack.c.bf16 %v2850_v61, %v2849_v4  ;;  %v2224_v55 = vld [vmem:[%s5369_s0 + $0x61] sm:$0xff]  ;;  %v2225_v4 = vld [vmem:[%s5369_s0 + $0x69] sm:$0xff] }
 0x1be   :  { %3501 = vmatmul.mubr.msk.bf16.gmra.mrb[220].mxu1 %vm117_vm1, %v1965_v13  ;;  %3559 = vmatmul.mubr.msk.bf16.gmra.mrb[220].mxu0 %vm117_vm1, %v2246_v59 }
 0x1bf   :  { %3504 = vmatprep.mubr.msk.bf16.mxu1 %vm3624_vm0, %v3623_v0  ;;  %3562 = vmatprep.mubr.msk.bf16.mxu0 %vm3624_vm0, %v3623_v0 }
 0x1c1   :  { %v992_v8 = vpop.f32.mrb[116].mxu1  ;;  %v1267_v35 = vpop.f32.mrb[116].mxu0 }
 0x1c2   :  { %v1069_v51 = vadd.f32 %v992_v8, %v4554_v18  ;;  %v4881_v6 = vadd.f32 %v1267_v35, %v1067_v14  ;;  %v3270_v19 = vpop.f32.mrb[117].mxu1  ;;  %v3328_v38 = vpop.f32.mrb[117].mxu0  ;;  %v2851_v18 = vld [vmem:[%s5369_s0 + $0x170] sm:$0xff] }
 0x1c3   :  { %v995_v43 = vpop.f32.mrb[118].mxu1  ;;  %v1270_v42 = vpop.f32.mrb[118].mxu0  ;;  %v2249_v38 = vpack.c.bf16 %v2225_v4, %v2224_v55 }
 0x1c4   :  { %v1070_v44 = vadd.f32 %v995_v43, %v4557_v23  ;;  %v4884_v58 = vadd.f32 %v1270_v42, %v1068_v41  ;;  %v3329_v46 = vpop.f32.mrb[119].mxu0  ;;  %v3271_v52 = vpop.f32.mrb[119].mxu1  ;;  %v2852_v23 = vld [vmem:[%s5369_s0 + $0x178] sm:$0xff] }
 0x1c5   :  { %v1967_v11 = vpack.c.bf16 %v2852_v23, %v2851_v18  ;;  %v2226_v52 = vld [vmem:[%s5369_s0 + $0x71] sm:$0xff]  ;;  %v2227_v18 = vld [vmem:[%s5369_s0 + $0x79] sm:$0xff] }
 0x1c6   :  { %3505 = vmatmul.mubr.msk.bf16.gmra.mrb[224].mxu1 %vm117_vm1, %v1966_v49  ;;  %3563 = vmatmul.mubr.msk.bf16.gmra.mrb[224].mxu0 %vm117_vm1, %v2247_v20 }
 0x1c7   :  { %3508 = vmatprep.mubr.msk.bf16.mxu1 %vm3624_vm0, %v3623_v0  ;;  %3566 = vmatprep.mubr.msk.bf16.mxu0 %vm3624_vm0, %v3623_v0 }
 0x1c9   :  { %v1000_v36 = vpop.f32.mrb[120].mxu1  ;;  %v1275_v16 = vpop.f32.mrb[120].mxu0 }
 0x1ca   :  { %v1071_v24 = vadd.f32 %v1000_v36, %v4573_v33  ;;  %v4905_v37 = vadd.f32 %v1275_v16, %v1069_v51  ;;  %v3274_v15 = vpop.f32.mrb[121].mxu1  ;;  %v3332_v14 = vpop.f32.mrb[121].mxu0  ;;  %v2853_v33 = vld [vmem:[%s5369_s0 + $0x180] sm:$0xff] }
 0x1cb   :  { %v1003_v13 = vpop.f32.mrb[122].mxu1  ;;  %v1278_v59 = vpop.f32.mrb[122].mxu0  ;;  %v2250_v14 = vpack.c.bf16 %v2227_v18, %v2226_v52 }
 0x1cc   :  { %v1072_v28 = vadd.f32 %v1003_v13, %v4576_v7  ;;  %v4908_v34 = vadd.f32 %v1278_v59, %v1070_v44  ;;  %v3333_v41 = vpop.f32.mrb[123].mxu0  ;;  %v3275_v12 = vpop.f32.mrb[123].mxu1  ;;  %v2854_v7 = vld [vmem:[%s5369_s0 + $0x188] sm:$0xff] }
 0x1cd   :  { %v1968_v19 = vpack.c.bf16 %v2854_v7, %v2853_v33  ;;  %v2228_v12 = vld [vmem:[%s5369_s0 + $0x81] sm:$0xff]  ;;  %v2229_v33 = vld [vmem:[%s5369_s0 + $0x89] sm:$0xff] }
 0x1ce   :  { %3509 = vmatmul.mubr.msk.bf16.gmra.mrb[228].mxu1 %vm117_vm1, %v1967_v11  ;;  %3567 = vmatmul.mubr.msk.bf16.gmra.mrb[228].mxu0 %vm117_vm1, %v2248_v40 }
 0x1cf   :  { %3512 = vmatprep.mubr.msk.bf16.mxu1 %vm3624_vm0, %v3623_v0  ;;  %3570 = vmatprep.mubr.msk.bf16.mxu0 %vm3624_vm0, %v3623_v0 }
 0x1d1   :  { %v1008_v61 = vpop.f32.mrb[124].mxu1  ;;  %v1283_v62 = vpop.f32.mrb[124].mxu0 }
 0x1d2   :  { %v1073_v57 = vadd.f32 %v1008_v61, %v4592_v9  ;;  %v4929_v8 = vadd.f32 %v1283_v62, %v1071_v24  ;;  %v3278_v35 = vpop.f32.mrb[125].mxu1  ;;  %v3336_v51 = vpop.f32.mrb[125].mxu0  ;;  %v2855_v9 = vld [vmem:[%s5369_s0 + $0x190] sm:$0xff] }
 0x1d3   :  { %v1011_v49 = vpop.f32.mrb[126].mxu1  ;;  %v1286_v20 = vpop.f32.mrb[126].mxu0  ;;  %v2251_v51 = vpack.c.bf16 %v2229_v33, %v2228_v12 }
 0x1d4   :  { %v1074_v43 = vadd.f32 %v1011_v49, %v4595_v21  ;;  %v4932_v42 = vadd.f32 %v1286_v20, %v1072_v28  ;;  %v3337_v44 = vpop.f32.mrb[127].mxu0  ;;  %v3279_v46 = vpop.f32.mrb[127].mxu1  ;;  %v2856_v21 = vld [vmem:[%s5369_s0 + $0x198] sm:$0xff] }
 0x1d5   :  { %v1969_v15 = vpack.c.bf16 %v2856_v21, %v2855_v9  ;;  %v2230_v46 = vld [vmem:[%s5369_s0 + $0x91] sm:$0xff]  ;;  %v2231_v9 = vld [vmem:[%s5369_s0 + $0x99] sm:$0xff] }
 0x1d6   :  { %3513 = vmatmul.mubr.msk.bf16.gmra.mrb[232].mxu1 %vm117_vm1, %v1968_v19  ;;  %3571 = vmatmul.mubr.msk.bf16.gmra.mrb[232].mxu0 %vm117_vm1, %v2249_v38 }
 0x1d7   :  { %3516 = vmatprep.mubr.msk.bf16.mxu1 %vm3624_vm0, %v3623_v0  ;;  %3574 = vmatprep.mubr.msk.bf16.mxu0 %vm3624_vm0, %v3623_v0 }
 0x1d9   :  { %v1016_v23 = vpop.f32.mrb[128].mxu1  ;;  %v1291_v60 = vpop.f32.mrb[128].mxu0 }
 0x1da   :  { %v1075_v22 = vadd.f32 %v1016_v23, %v4617_v30  ;;  %v4953_v36 = vadd.f32 %v1291_v60, %v1073_v57  ;;  %v3282_v16 = vpop.f32.mrb[129].mxu1  ;;  %v3340_v24 = vpop.f32.mrb[129].mxu0  ;;  %v2857_v30 = vld [vmem:[%s5369_s0 + $0x1a0] sm:$0xff] }
 0x1db   :  { %v1019_v11 = vpop.f32.mrb[130].mxu1  ;;  %v1294_v40 = vpop.f32.mrb[130].mxu0  ;;  %v2252_v24 = vpack.c.bf16 %v2231_v9, %v2230_v46 }
 0x1dc   :  { %v1076_v13 = vadd.f32 %v1019_v11, %v4620_v39  ;;  %v4956_v59 = vadd.f32 %v1294_v40, %v1074_v43  ;;  %v3341_v28 = vpop.f32.mrb[131].mxu0  ;;  %v3283_v41 = vpop.f32.mrb[131].mxu1  ;;  %v2858_v39 = vld [vmem:[%s5369_s0 + $0x1a8] sm:$0xff] }
 0x1dd   :  { %v1970_v35 = vpack.c.bf16 %v2858_v39, %v2857_v30  ;;  %v2232_v41 = vld [vmem:[%s5369_s0 + $0xa1] sm:$0xff]  ;;  %v2233_v30 = vld [vmem:[%s5369_s0 + $0xa9] sm:$0xff] }
 0x1de   :  { %3517 = vmatmul.mubr.msk.bf16.gmra.mrb[236].mxu1 %vm117_vm1, %v1969_v15  ;;  %3575 = vmatmul.mubr.msk.bf16.gmra.mrb[236].mxu0 %vm117_vm1, %v2250_v14 }
 0x1df   :  { %3520 = vmatprep.mubr.msk.bf16.mxu1 %vm3624_vm0, %v3623_v0  ;;  %3578 = vmatprep.mubr.msk.bf16.mxu0 %vm3624_vm0, %v3623_v0 }
 0x1e1   :  { %v1024_v7 = vpop.f32.mrb[132].mxu1  ;;  %v1299_v55 = vpop.f32.mrb[132].mxu0 }
 0x1e2   :  { %v1077_v4 = vadd.f32 %v1024_v7, %v4641_v17  ;;  %v4977_v61 = vadd.f32 %v1299_v55, %v1075_v22  ;;  %v3286_v62 = vpop.f32.mrb[133].mxu1  ;;  %v3344_v57 = vpop.f32.mrb[133].mxu0  ;;  %v2859_v17 = vld [vmem:[%s5369_s0 + $0x1b0] sm:$0xff] }
 0x1e3   :  { %v1027_v19 = vpop.f32.mrb[134].mxu1  ;;  %v1302_v38 = vpop.f32.mrb[134].mxu0  ;;  %v2253_v57 = vpack.c.bf16 %v2233_v30, %v2232_v41 }
 0x1e4   :  { %v1078_v49 = vadd.f32 %v1027_v19, %v4644_v3  ;;  %v4980_v20 = vadd.f32 %v1302_v38, %v1076_v13  ;;  %v3345_v43 = vpop.f32.mrb[135].mxu0  ;;  %v3287_v44 = vpop.f32.mrb[135].mxu1  ;;  %v2860_v3 = vld [vmem:[%s5369_s0 + $0x1b8] sm:$0xff] }
 0x1e5   :  { %v1971_v16 = vpack.c.bf16 %v2860_v3, %v2859_v17  ;;  %v2234_v44 = vld [vmem:[%s5369_s0 + $0xb1] sm:$0xff]  ;;  %v2235_v17 = vld [vmem:[%s5369_s0 + $0xb9] sm:$0xff] }
 0x1e6   :  { %3521 = vmatmul.mubr.msk.bf16.gmra.mrb[240].mxu1 %vm117_vm1, %v1970_v35  ;;  %3579 = vmatmul.mubr.msk.bf16.gmra.mrb[240].mxu0 %vm117_vm1, %v2251_v51 }
 0x1e7   :  { %3524 = vmatprep.mubr.msk.bf16.mxu1 %vm3624_vm0, %v3623_v0  ;;  %3582 = vmatprep.mubr.msk.bf16.mxu0 %vm3624_vm0, %v3623_v0 }
 0x1e9   :  { %v1032_v21 = vpop.f32.mrb[136].mxu1  ;;  %v1307_v52 = vpop.f32.mrb[136].mxu0 }
 0x1ea   :  { %v1079_v18 = vadd.f32 %v1032_v21, %v4665_v47  ;;  %v5001_v23 = vadd.f32 %v1307_v52, %v1077_v4  ;;  %v3290_v60 = vpop.f32.mrb[137].mxu1  ;;  %v3348_v22 = vpop.f32.mrb[137].mxu0  ;;  %v2861_v47 = vld [vmem:[%s5369_s0 + $0x1c0] sm:$0xff] }
 0x1eb   :  { %v1035_v15 = vpop.f32.mrb[138].mxu1  ;;  %v1310_v14 = vpop.f32.mrb[138].mxu0  ;;  %v2254_v22 = vpack.c.bf16 %v2235_v17, %v2234_v44 }
 0x1ec   :  { %v1080_v11 = vadd.f32 %v1035_v15, %v4668_v26  ;;  %v5004_v40 = vadd.f32 %v1310_v14, %v1078_v49  ;;  %v3349_v13 = vpop.f32.mrb[139].mxu0  ;;  %v3291_v28 = vpop.f32.mrb[139].mxu1  ;;  %v2862_v26 = vld [vmem:[%s5369_s0 + $0x1c8] sm:$0xff] }
 0x1ed   :  { %v1972_v62 = vpack.c.bf16 %v2862_v26, %v2861_v47  ;;  %v2236_v28 = vld [vmem:[%s5369_s0 + $0xc1] sm:$0xff]  ;;  %v2237_v47 = vld [vmem:[%s5369_s0 + $0xc9] sm:$0xff] }
 0x1ee   :  { %3525 = vmatmul.mubr.msk.bf16.gmra.mrb[244].mxu1 %vm117_vm1, %v1971_v16  ;;  %3583 = vmatmul.mubr.msk.bf16.gmra.mrb[244].mxu0 %vm117_vm1, %v2252_v24 }
 0x1ef   :  { %3528 = vmatprep.mubr.msk.bf16.mxu1 %vm3624_vm0, %v3623_v0  ;;  %3586 = vmatprep.mubr.msk.bf16.mxu0 %vm3624_vm0, %v3623_v0 }
 0x1f1   :  { %v1040_v39 = vpop.f32.mrb[140].mxu1  ;;  %v1315_v12 = vpop.f32.mrb[140].mxu0 }
 0x1f2   :  { %v1081_v33 = vadd.f32 %v1040_v39, %v4689_v45  ;;  %v5025_v7 = vadd.f32 %v1315_v12, %v1079_v18  ;;  %v3294_v55 = vpop.f32.mrb[141].mxu1  ;;  %v3352_v4 = vpop.f32.mrb[141].mxu0  ;;  %v2863_v45 = vld [vmem:[%s5369_s0 + $0x1d0] sm:$0xff] }
 0x1f3   :  { %v1043_v35 = vpop.f32.mrb[142].mxu1  ;;  %v1318_v51 = vpop.f32.mrb[142].mxu0  ;;  %v2255_v4 = vpack.c.bf16 %v2237_v47, %v2236_v28 }
 0x1f4   :  { %v1082_v19 = vadd.f32 %v1043_v35, %v4692_v2  ;;  %v5028_v38 = vadd.f32 %v1318_v51, %v1080_v11  ;;  %v3353_v49 = vpop.f32.mrb[143].mxu0  ;;  %v3295_v43 = vpop.f32.mrb[143].mxu1  ;;  %v2864_v2 = vld [vmem:[%s5369_s0 + $0x1d8] sm:$0xff] }
 0x1f5   :  { %v1973_v60 = vpack.c.bf16 %v2864_v2, %v2863_v45  ;;  %v2238_v43 = vld [vmem:[%s5369_s0 + $0xd1] sm:$0xff]  ;;  %v2239_v45 = vld [vmem:[%s5369_s0 + $0xd9] sm:$0xff] }
 0x1f6   :  { %3529 = vmatmul.mubr.msk.bf16.gmra.mrb[248].mxu1 %vm117_vm1, %v1972_v62  ;;  %3587 = vmatmul.mubr.msk.bf16.gmra.mrb[248].mxu0 %vm117_vm1, %v2253_v57 }
 0x1f7   :  { %3532 = vmatprep.mubr.msk.bf16.mxu1 %vm3624_vm0, %v3623_v0  ;;  %3590 = vmatprep.mubr.msk.bf16.mxu0 %vm3624_vm0, %v3623_v0 }
 0x1f9   :  { %v1048_v3 = vpop.f32.mrb[144].mxu1  ;;  %v1323_v46 = vpop.f32.mrb[144].mxu0 }
 0x1fa   :  { %v1083_v9 = vadd.f32 %v1048_v3, %v4712_v27  ;;  %v5049_v21 = vadd.f32 %v1323_v46, %v1081_v33  ;;  %v3298_v52 = vpop.f32.mrb[145].mxu1  ;;  %v3356_v18 = vpop.f32.mrb[145].mxu0  ;;  %v2865_v27 = vld [vmem:[%s5369_s0 + $0x1e0] sm:$0xff] }
 0x1fb   :  { %v1051_v16 = vpop.f32.mrb[146].mxu1  ;;  %v1326_v24 = vpop.f32.mrb[146].mxu0  ;;  %v2256_v18 = vpack.c.bf16 %v2239_v45, %v2238_v43 }
 0x1fc   :  { %v1084_v15 = vadd.f32 %v1051_v16, %v4715_v63  ;;  %v5052_v14 = vadd.f32 %v1326_v24, %v1082_v19  ;;  %v3357_v11 = vpop.f32.mrb[147].mxu0  ;;  %v3299_v13 = vpop.f32.mrb[147].mxu1  ;;  %v2866_v63 = vld [vmem:[%s5369_s0 + $0x1e8] sm:$0xff] }
 0x1fd   :  { %v1974_v55 = vpack.c.bf16 %v2866_v63, %v2865_v27  ;;  %v2240_v13 = vld [vmem:[%s5369_s0 + $0xe1] sm:$0xff]  ;;  %v2241_v27 = vld [vmem:[%s5369_s0 + $0xe9] sm:$0xff] }
 0x1fe   :  { %3533 = vmatmul.mubr.msk.bf16.gmra.mrb[252].mxu1 %vm117_vm1, %v1973_v60  ;;  %3591 = vmatmul.mubr.msk.bf16.gmra.mrb[252].mxu0 %vm117_vm1, %v2254_v22 }
 0x1ff   :  { %3536 = vmatprep.mubr.msk.bf16.mxu1 %vm3624_vm0, %v3623_v0  ;;  %3594 = vmatprep.mubr.msk.bf16.mxu0 %vm3624_vm0, %v3623_v0 }
 0x201   :  { %v1331_v26 = vpop.f32.mrb[148].mxu0  ;;  %v1501_v41 = vpop.f32.mrb[148].mxu1 }
 0x202   :  { %v5072_v30 = vadd.f32 %v1331_v26, %v1083_v9  ;;  %v1620_v39 = vadd.f32 %v1501_v41, %v4737_v48  ;;  %v3360_v12 = vpop.f32.mrb[149].mxu0  ;;  %v3366_v33 = vpop.f32.mrb[149].mxu1  ;;  %v2867_v48 = vld [vmem:[%s5369_s0 + $0x1f0] sm:$0xff] }
 0x203   :  { %v1334_v62 = vpop.f32.mrb[150].mxu0  ;;  %v1504_v57 = vpop.f32.mrb[150].mxu1  ;;  %v2257_v33 = vpack.c.bf16 %v2241_v27, %v2240_v13 }
 0x204   :  { %v5075_v35 = vadd.f32 %v1334_v62, %v1084_v15  ;;  %v1621_v51 = vadd.f32 %v1504_v57, %v4740_v25  ;;  %v3361_v19 = vpop.f32.mrb[151].mxu0  ;;  %v3367_v49 = vpop.f32.mrb[151].mxu1  ;;  %v2868_v25 = vld [vmem:[%s5369_s0 + $0x1f8] sm:$0xff] }
 0x205   :  { %v1975_v52 = vpack.c.bf16 %v2868_v25, %v2867_v48  ;;  %v2243_v49 = vld [vmem:[%s5369_s0 + $0xf9] sm:$0xff] }
 0x206   :  { %3537 = vmatmul.mubr.msk.bf16.gmra.mrb[0].mxu1 %vm117_vm1, %v1974_v55  ;;  %3595 = vmatmul.mubr.msk.bf16.gmra.mrb[0].mxu0 %vm117_vm1, %v2255_v4 }
 0x207   :  { %3540 = vmatprep.mubr.msk.bf16.mxu1 %vm3624_vm0, %v3623_v0  ;;  %3598 = vmatprep.mubr.msk.bf16.mxu0 %vm3624_vm0, %v3623_v0 }
 0x209   :  { %v1509_v2 = vpop.f32.mrb[152].mxu1  ;;  %v1783_v44 = vpop.f32.mrb[152].mxu0 }
 0x20a   :  { %v1622_v17 = vadd.f32 %v1509_v2, %v4761_v5  ;;  %v5097_v3 = vadd.f32 %v1783_v44, %v1620_v39  ;;  %v3370_v46 = vpop.f32.mrb[153].mxu1  ;;  %v3428_v9 = vpop.f32.mrb[153].mxu0  ;;  %v2869_v5 = vld [vmem:[%s5369_s0 + $0x200] sm:$0xff] }
 0x20b   :  { %v1512_v60 = vpop.f32.mrb[154].mxu1  ;;  %v1786_v22 = vpop.f32.mrb[154].mxu0 }
 0x20c   :  { %v1623_v16 = vadd.f32 %v1512_v60, %v4764_v56  ;;  %v5100_v24 = vadd.f32 %v1786_v22, %v1621_v51  ;;  %v3429_v15 = vpop.f32.mrb[155].mxu0  ;;  %v3371_v11 = vpop.f32.mrb[155].mxu1  ;;  %v2870_v56 = vld [vmem:[%s5369_s0 + $0x208] sm:$0xff] }
 0x20d   :  { %v1976_v12 = vpack.c.bf16 %v2870_v56, %v2869_v5 }
 0x20e   :  { %3541 = vmatmul.mubr.msk.bf16.gmra.mrb[4].mxu1 %vm117_vm1, %v1975_v52  ;;  %3599 = vmatmul.mubr.msk.bf16.gmra.mrb[4].mxu0 %vm117_vm1, %v2256_v18 }
 0x20f   :  { %3544 = vmatprep.mubr.msk.bf16.mxu1 %vm3624_vm0, %v3623_v0  ;;  %3602 = vmatprep.mubr.msk.bf16.mxu0 %vm3624_vm0, %v3623_v0 }
 0x211   :  { %v1517_v63 = vpop.f32.mrb[156].mxu1  ;;  %v1791_v28 = vpop.f32.mrb[156].mxu0 }
 0x212   :  { %v1624_v47 = vadd.f32 %v1517_v63, %v4785_v29  ;;  %v5121_v26 = vadd.f32 %v1791_v28, %v1622_v17  ;;  %v3374_v41 = vpop.f32.mrb[157].mxu1  ;;  %v3432_v39 = vpop.f32.mrb[157].mxu0  ;;  %v2242_v29 = vld [vmem:[%s5369_s0 + $0xf1] sm:$0xff] }
 0x213   :  { %v1520_v55 = vpop.f32.mrb[158].mxu1  ;;  %v1794_v4 = vpop.f32.mrb[158].mxu0  ;;  %v2258_v44 = vpack.c.bf16 %v2243_v49, %v2242_v29 }
 0x214   :  { %v1625_v62 = vadd.f32 %v1520_v55, %v4788_v53  ;;  %v5124_v57 = vadd.f32 %v1794_v4, %v1623_v16  ;;  %v3433_v51 = vpop.f32.mrb[159].mxu0  ;;  %v3375_v19 = vpop.f32.mrb[159].mxu1 }
 0x216   :  { %3545 = vmatmul.mubr.msk.bf16.gmra.mrb[8].mxu1 %vm117_vm1, %v1976_v12  ;;  %3603 = vmatmul.mubr.msk.bf16.gmra.mrb[8].mxu0 %vm117_vm1, %v2257_v33 }
 0x217   :  { %3606 = vmatprep.mubr.msk.bf16.mxu0 %vm3624_vm0, %v3623_v0 }
 0x219   :  { %v1525_v53 = vpop.f32.mrb[160].mxu1  ;;  %v1799_v48 = vpop.f32.mrb[160].mxu0 }
 0x21a   :  { %v1626_v25 = vadd.f32 %v1525_v53, %v4809_v50  ;;  %v5137_v43 = vadd.f32 %v1799_v48, %v1624_v47  ;;  %v3378_v45 = vpop.f32.mrb[161].mxu1  ;;  %v3436_v2 = vpop.f32.mrb[161].mxu0 }
 0x21b   :  { %v1528_v17 = vpop.f32.mrb[162].mxu1  ;;  %v1802_v46 = vpop.f32.mrb[162].mxu0 }
 0x21c   :  { %v1627_v0 = vadd.f32 %v1528_v17, %v4812_v1  ;;  %v5140_v9 = vadd.f32 %v1802_v46, %v1625_v62  ;;  %v3437_v52 = vpop.f32.mrb[163].mxu0  ;;  %v3379_v18 = vpop.f32.mrb[163].mxu1 }
 0x21e   :  { %3607 = vmatmul.mubr.msk.bf16.gmra.mrb[12].mxu0 %vm117_vm1, %v2258_v44 }
 0x221   :  { %v1533_v60 = vpop.f32.mrb[164].mxu1  ;;  %v1807_v22 = vpop.f32.mrb[164].mxu0 }
 0x222   :  { %v1628_v16 = vadd.f32 %v1533_v60, %v4833_v54  ;;  %v5144_v50 = vadd.f32 %v1807_v22, %v1626_v25  ;;  %v3382_v15 = vpop.f32.mrb[165].mxu1  ;;  %v3440_v11 = vpop.f32.mrb[165].mxu0 }
 0x223   :  { %v1536_v5 = vpop.f32.mrb[166].mxu1  ;;  %v1810_v56 = vpop.f32.mrb[166].mxu0 }
 0x224   :  { %v1629_v13 = vadd.f32 %v1536_v5, %v4836_v10  ;;  %v5147_v27 = vadd.f32 %v1810_v56, %v1627_v0  ;;  %v3441_v1 = vpop.f32.mrb[167].mxu0  ;;  %v3383_v63 = vpop.f32.mrb[167].mxu1 }
 0x229   :  { %v1541_v28 = vpop.f32.mrb[168].mxu1  ;;  %v1815_v47 = vpop.f32.mrb[168].mxu0 }
 0x22a   :  { %v1630_v41 = vadd.f32 %v1541_v28, %v4857_v32  ;;  %v5150_v39 = vadd.f32 %v1815_v47, %v1628_v16  ;;  %v3386_v12 = vpop.f32.mrb[169].mxu1  ;;  %v3444_v54 = vpop.f32.mrb[169].mxu0 }
 0x22b   :  { %v1544_v33 = vpop.f32.mrb[170].mxu1  ;;  %v1818_v55 = vpop.f32.mrb[170].mxu0 }
 0x22c   :  { %v1631_v4 = vadd.f32 %v1544_v33, %v4860_v31  ;;  %v5153_v62 = vadd.f32 %v1818_v55, %v1629_v13  ;;  %v3445_v51 = vpop.f32.mrb[171].mxu0  ;;  %v3387_v10 = vpop.f32.mrb[171].mxu1 }
 0x231   :  { %v1549_v19 = vpop.f32.mrb[172].mxu1  ;;  %v1823_v29 = vpop.f32.mrb[172].mxu0 }
 0x232   :  { %v1632_v49 = vadd.f32 %v1549_v19, %v4881_v6  ;;  %v5156_v53 = vadd.f32 %v1823_v29, %v1630_v41  ;;  %v3390_v48 = vpop.f32.mrb[173].mxu1  ;;  %v3448_v32 = vpop.f32.mrb[173].mxu0 }
 0x233   :  { %v1552_v25 = vpop.f32.mrb[174].mxu1  ;;  %v1826_v45 = vpop.f32.mrb[174].mxu0 }
 0x234   :  { %v1633_v2 = vadd.f32 %v1552_v25, %v4884_v58  ;;  %v5159_v44 = vadd.f32 %v1826_v45, %v1631_v4  ;;  %v3449_v17 = vpop.f32.mrb[175].mxu0  ;;  %v3391_v31 = vpop.f32.mrb[175].mxu1 }
 0x239   :  { %v1557_v46 = vpop.f32.mrb[176].mxu1  ;;  %v1831_v0 = vpop.f32.mrb[176].mxu0 }
 0x23a   :  { %v1634_v52 = vadd.f32 %v1557_v46, %v4905_v37  ;;  %v5162_v18 = vadd.f32 %v1831_v0, %v1632_v49  ;;  %v3394_v60 = vpop.f32.mrb[177].mxu1  ;;  %v3452_v6 = vpop.f32.mrb[177].mxu0 }
 0x23b   :  { %v1560_v22 = vpop.f32.mrb[178].mxu1  ;;  %v1834_v16 = vpop.f32.mrb[178].mxu0 }
 0x23c   :  { %v1635_v15 = vadd.f32 %v1560_v22, %v4908_v34  ;;  %v5165_v11 = vadd.f32 %v1834_v16, %v1633_v2  ;;  %v3453_v5 = vpop.f32.mrb[179].mxu0  ;;  %v3395_v58 = vpop.f32.mrb[179].mxu1 }
 0x241   :  { %v1565_v56 = vpop.f32.mrb[180].mxu1  ;;  %v1839_v13 = vpop.f32.mrb[180].mxu0 }
 0x242   :  { %v1636_v1 = vadd.f32 %v1565_v56, %v4929_v8  ;;  %v5168_v63 = vadd.f32 %v1839_v13, %v1634_v52  ;;  %v3398_v28 = vpop.f32.mrb[181].mxu1  ;;  %v3456_v37 = vpop.f32.mrb[181].mxu0 }
 0x243   :  { %v1568_v47 = vpop.f32.mrb[182].mxu1  ;;  %v1842_v41 = vpop.f32.mrb[182].mxu0 }
 0x244   :  { %v1637_v12 = vadd.f32 %v1568_v47, %v4932_v42  ;;  %v5171_v54 = vadd.f32 %v1842_v41, %v1635_v15  ;;  %v3457_v33 = vpop.f32.mrb[183].mxu0  ;;  %v3399_v34 = vpop.f32.mrb[183].mxu1 }
 0x249   :  { %v1573_v55 = vpop.f32.mrb[184].mxu1  ;;  %v1847_v4 = vpop.f32.mrb[184].mxu0 }
 0x24a   :  { %v1638_v51 = vadd.f32 %v1573_v55, %v4953_v36  ;;  %v5174_v10 = vadd.f32 %v1847_v4, %v1636_v1  ;;  %v3402_v19 = vpop.f32.mrb[185].mxu1  ;;  %v3460_v8 = vpop.f32.mrb[185].mxu0 }
 0x24b   :  { %v1576_v29 = vpop.f32.mrb[186].mxu1  ;;  %v1850_v49 = vpop.f32.mrb[186].mxu0 }
 0x24c   :  { %v1639_v48 = vadd.f32 %v1576_v29, %v4956_v59  ;;  %v5177_v32 = vadd.f32 %v1850_v49, %v1637_v12  ;;  %v3461_v25 = vpop.f32.mrb[187].mxu0  ;;  %v3403_v42 = vpop.f32.mrb[187].mxu1 }
 0x251   :  { %v1581_v45 = vpop.f32.mrb[188].mxu1  ;;  %v1855_v2 = vpop.f32.mrb[188].mxu0 }
 0x252   :  { %v1640_v17 = vadd.f32 %v1581_v45, %v4977_v61  ;;  %v5180_v31 = vadd.f32 %v1855_v2, %v1638_v51  ;;  %v3406_v46 = vpop.f32.mrb[189].mxu1  ;;  %v3464_v36 = vpop.f32.mrb[189].mxu0 }
 0x253   :  { %v1584_v0 = vpop.f32.mrb[190].mxu1  ;;  %v1858_v52 = vpop.f32.mrb[190].mxu0 }
 0x254   :  { %v1641_v60 = vadd.f32 %v1584_v0, %v4980_v20  ;;  %v5183_v6 = vadd.f32 %v1858_v52, %v1639_v48  ;;  %v3465_v22 = vpop.f32.mrb[191].mxu0  ;;  %v3407_v59 = vpop.f32.mrb[191].mxu1 }
 0x259   :  { %v1589_v16 = vpop.f32.mrb[192].mxu1  ;;  %v1863_v15 = vpop.f32.mrb[192].mxu0 }
 0x25a   :  { %v1642_v5 = vadd.f32 %v1589_v16, %v5001_v23  ;;  %v5186_v58 = vadd.f32 %v1863_v15, %v1640_v17  ;;  %v3410_v56 = vpop.f32.mrb[193].mxu1  ;;  %v3468_v61 = vpop.f32.mrb[193].mxu0 }
 0x25b   :  { %v1592_v13 = vpop.f32.mrb[194].mxu1  ;;  %v1866_v1 = vpop.f32.mrb[194].mxu0 }
 0x25c   :  { %v1643_v28 = vadd.f32 %v1592_v13, %v5004_v40  ;;  %v5189_v37 = vadd.f32 %v1866_v1, %v1641_v60  ;;  %v3469_v47 = vpop.f32.mrb[195].mxu0  ;;  %v3411_v20 = vpop.f32.mrb[195].mxu1 }
 0x261   :  { %v1597_v41 = vpop.f32.mrb[196].mxu1  ;;  %v1871_v12 = vpop.f32.mrb[196].mxu0 }
 0x262   :  { %v1644_v33 = vadd.f32 %v1597_v41, %v5025_v7  ;;  %v5192_v34 = vadd.f32 %v1871_v12, %v1642_v5  ;;  %v3414_v55 = vpop.f32.mrb[197].mxu1  ;;  %v3472_v23 = vpop.f32.mrb[197].mxu0 }
 0x263   :  { %v1600_v4 = vpop.f32.mrb[198].mxu1  ;;  %v1874_v51 = vpop.f32.mrb[198].mxu0 }
 0x264   :  { %v1645_v19 = vadd.f32 %v1600_v4, %v5028_v38  ;;  %v5195_v8 = vadd.f32 %v1874_v51, %v1643_v28  ;;  %v3473_v29 = vpop.f32.mrb[199].mxu0  ;;  %v3415_v40 = vpop.f32.mrb[199].mxu1 }
 0x265   :  { %v5218_v29 = vld [vmem:[%s5370_s2] ss:$0 sm:$0xff] }
 0x269   :  { %v1605_v49 = vpop.f32.mrb[200].mxu1  ;;  %v1879_v48 = vpop.f32.mrb[200].mxu0 }
 0x26a   :  { %v1646_v25 = vadd.f32 %v1605_v49, %v5049_v21  ;;  %v5198_v42 = vadd.f32 %v1879_v48, %v1644_v33  ;;  %v3418_v45 = vpop.f32.mrb[201].mxu1  ;;  %v3476_v7 = vpop.f32.mrb[201].mxu0 }
 0x26b   :  { %v1608_v2 = vpop.f32.mrb[202].mxu1  ;;  %v1882_v17 = vpop.f32.mrb[202].mxu0 }
 0x26c   :  { %v1647_v46 = vadd.f32 %v1608_v2, %v5052_v14  ;;  %v5201_v36 = vadd.f32 %v1882_v17, %v1645_v19  ;;  %v3477_v0 = vpop.f32.mrb[203].mxu0  ;;  %v3419_v38 = vpop.f32.mrb[203].mxu1 }
 0x271   :  { %v1613_v52 = vpop.f32.mrb[204].mxu1  ;;  %v1887_v60 = vpop.f32.mrb[204].mxu0 }
 0x272   :  { %v1648_v22 = vadd.f32 %v1613_v52, %v5072_v30  ;;  %v5204_v59 = vadd.f32 %v1887_v60, %v1646_v25  ;;  %v3422_v16 = vpop.f32.mrb[205].mxu1  ;;  %v3480_v21 = vpop.f32.mrb[205].mxu0 }
 0x273   :  { %v1616_v15 = vpop.f32.mrb[206].mxu1  ;;  %v1890_v5 = vpop.f32.mrb[206].mxu0 }
 0x274   :  { %v1649_v56 = vadd.f32 %v1616_v15, %v5075_v35  ;;  %v5207_v61 = vadd.f32 %v1890_v5, %v1647_v46  ;;  %v3481_v13 = vpop.f32.mrb[207].mxu0  ;;  %v3423_v14 = vpop.f32.mrb[207].mxu1 }
 0x279   :  { %v1895_v1 = vpop.f32.mrb[208].mxu0  ;;  %v2065_v28 = vpop.f32.mrb[208].mxu1 }
 0x27a   :  { %v5209_v47 = vadd.f32 %v1895_v1, %v1648_v22  ;;  %v2184_v20 = vadd.f32 %v2065_v28, %v5097_v3  ;;  %v3484_v41 = vpop.f32.mrb[209].mxu0  ;;  %v3490_v30 = vpop.f32.mrb[209].mxu1 }
 0x27b   :  { %v1898_v12 = vpop.f32.mrb[210].mxu0  ;;  %v2068_v33 = vpop.f32.mrb[210].mxu1 }
 0x27c   :  { %v5212_v55 = vadd.f32 %v1898_v12, %v1649_v56  ;;  %v2185_v23 = vadd.f32 %v2068_v33, %v5100_v24  ;;  %v3485_v4 = vpop.f32.mrb[211].mxu0  ;;  %v3491_v35 = vpop.f32.mrb[211].mxu1 }
 0x281   :  { %v2073_v51 = vpop.f32.mrb[212].mxu1  ;;  %v2347_v19 = vpop.f32.mrb[212].mxu0 }
 0x282   :  { %v2186_v40 = vadd.f32 %v2073_v51, %v5121_v26  ;;  %v2466_v3 = vadd.f32 %v2347_v19, %v2184_v20  ;;  %v3494_v49 = vpop.f32.mrb[213].mxu1  ;;  %v3552_v48 = vpop.f32.mrb[213].mxu0 }
 0x283   :  { %v2076_v25 = vpop.f32.mrb[214].mxu1  ;;  %v2350_v45 = vpop.f32.mrb[214].mxu0 }
 0x284   :  { %v2503_v7 = vadd.f32 %v5218_v29, %v2466_v3  ;;  %v2187_v24 = vadd.f32 %v2076_v25, %v5124_v57  ;;  %v2467_v2 = vadd.f32 %v2350_v45, %v2185_v23  ;;  %v3553_v17 = vpop.f32.mrb[215].mxu0  ;;  %v3495_v46 = vpop.f32.mrb[215].mxu1 }
 0x286   :  { %v2533_v0 = vmax.f32 %v2503_v7, 0.0  ;;  %v2504_v38 = vadd.f32 %v5218_v29, %v2467_v2 }
 0x288   :  { %2563 = vst [vmem:[%s5371_s3] sm:$0xff] %v2533_v0  ;;  %v2534_v26 = vmax.f32 %v2504_v38, 0.0 }
 0x289   :  { %v2081_v52 = vpop.f32.mrb[216].mxu1  ;;  %v2355_v60 = vpop.f32.mrb[216].mxu0 }
 0x28a   :  { %2564 = vst [vmem:[%s5371_s3 + $0x8] sm:$0xff] %v2534_v26  ;;  %v2188_v22 = vadd.f32 %v2081_v52, %v5137_v43  ;;  %v2468_v57 = vadd.f32 %v2355_v60, %v2186_v40  ;;  %v3498_v16 = vpop.f32.mrb[217].mxu1  ;;  %v3556_v21 = vpop.f32.mrb[217].mxu0 }
 0x28b   :  { %v2084_v15 = vpop.f32.mrb[218].mxu1  ;;  %v2358_v5 = vpop.f32.mrb[218].mxu0 }
 0x28c   :  { %v2505_v56 = vadd.f32 %v5218_v29, %v2468_v57  ;;  %v2189_v13 = vadd.f32 %v2084_v15, %v5140_v9  ;;  %v2469_v14 = vadd.f32 %v2358_v5, %v2187_v24  ;;  %v3557_v1 = vpop.f32.mrb[219].mxu0  ;;  %v3499_v28 = vpop.f32.mrb[219].mxu1 }
 0x28e   :  { %v2535_v20 = vmax.f32 %v2505_v56, 0.0  ;;  %v2506_v41 = vadd.f32 %v5218_v29, %v2469_v14 }
 0x290   :  { %2565 = vst [vmem:[%s5371_s3 + $0x10] sm:$0xff] %v2535_v20  ;;  %v2536_v43 = vmax.f32 %v2506_v41, 0.0 }
 0x291   :  { %v2089_v30 = vpop.f32.mrb[220].mxu1  ;;  %v2363_v12 = vpop.f32.mrb[220].mxu0 }
 0x292   :  { %2566 = vst [vmem:[%s5371_s3 + $0x18] sm:$0xff] %v2536_v43  ;;  %v2190_v33 = vadd.f32 %v2089_v30, %v5144_v50  ;;  %v2470_v9 = vadd.f32 %v2363_v12, %v2188_v22  ;;  %v3502_v23 = vpop.f32.mrb[221].mxu1  ;;  %v3560_v4 = vpop.f32.mrb[221].mxu0 }
 0x293   :  { %v2092_v35 = vpop.f32.mrb[222].mxu1  ;;  %v2366_v51 = vpop.f32.mrb[222].mxu0 }
 0x294   :  { %v2507_v19 = vadd.f32 %v5218_v29, %v2470_v9  ;;  %v2191_v40 = vadd.f32 %v2092_v35, %v5147_v27  ;;  %v2471_v3 = vadd.f32 %v2366_v51, %v2189_v13  ;;  %v3561_v49 = vpop.f32.mrb[223].mxu0  ;;  %v3503_v48 = vpop.f32.mrb[223].mxu1 }
 0x296   :  { %v2537_v25 = vmax.f32 %v2507_v19, 0.0  ;;  %v2508_v45 = vadd.f32 %v5218_v29, %v2471_v3 }
 0x298   :  { %2567 = vst [vmem:[%s5371_s3 + $0x20] sm:$0xff] %v2537_v25  ;;  %v2538_v50 = vmax.f32 %v2508_v45, 0.0 }
 0x299   :  { %v2097_v7 = vpop.f32.mrb[224].mxu1  ;;  %v2371_v24 = vpop.f32.mrb[224].mxu0 }
 0x29a   :  { %2568 = vst [vmem:[%s5371_s3 + $0x28] sm:$0xff] %v2538_v50  ;;  %v2192_v2 = vadd.f32 %v2097_v7, %v5150_v39  ;;  %v2472_v27 = vadd.f32 %v2371_v24, %v2190_v33  ;;  %v3506_v17 = vpop.f32.mrb[225].mxu1  ;;  %v3564_v46 = vpop.f32.mrb[225].mxu0 }
 0x29b   :  { %v2100_v0 = vpop.f32.mrb[226].mxu1  ;;  %v2374_v38 = vpop.f32.mrb[226].mxu0 }
 0x29c   :  { %v2509_v26 = vadd.f32 %v5218_v29, %v2472_v27  ;;  %v2193_v52 = vadd.f32 %v2100_v0, %v5153_v62  ;;  %v2473_v60 = vadd.f32 %v2374_v38, %v2191_v40  ;;  %v3565_v22 = vpop.f32.mrb[227].mxu0  ;;  %v3507_v57 = vpop.f32.mrb[227].mxu1 }
 0x29e   :  { %v2539_v16 = vmax.f32 %v2509_v26, 0.0  ;;  %v2510_v21 = vadd.f32 %v5218_v29, %v2473_v60 }
 0x2a0   :  { %2569 = vst [vmem:[%s5371_s3 + $0x30] sm:$0xff] %v2539_v16  ;;  %v2540_v39 = vmax.f32 %v2510_v21, 0.0 }
 0x2a1   :  { %v2105_v15 = vpop.f32.mrb[228].mxu1  ;;  %v2379_v5 = vpop.f32.mrb[228].mxu0 }
 0x2a2   :  { %2570 = vst [vmem:[%s5371_s3 + $0x38] sm:$0xff] %v2540_v39  ;;  %v2194_v56 = vadd.f32 %v2105_v15, %v5156_v53  ;;  %v2474_v62 = vadd.f32 %v2379_v5, %v2192_v2  ;;  %v3510_v13 = vpop.f32.mrb[229].mxu1  ;;  %v3568_v14 = vpop.f32.mrb[229].mxu0 }
 0x2a3   :  { %v2108_v1 = vpop.f32.mrb[230].mxu1  ;;  %v2382_v28 = vpop.f32.mrb[230].mxu0 }
 0x2a4   :  { %v2511_v20 = vadd.f32 %v5218_v29, %v2474_v62  ;;  %v2195_v41 = vadd.f32 %v2108_v1, %v5159_v44  ;;  %v2475_v43 = vadd.f32 %v2382_v28, %v2193_v52  ;;  %v3569_v30 = vpop.f32.mrb[231].mxu0  ;;  %v3511_v12 = vpop.f32.mrb[231].mxu1 }
 0x2a6   :  { %v2541_v33 = vmax.f32 %v2511_v20, 0.0  ;;  %v2512_v9 = vadd.f32 %v5218_v29, %v2475_v43 }
 0x2a8   :  { %2571 = vst [vmem:[%s5371_s3 + $0x40] sm:$0xff] %v2541_v33  ;;  %v2542_v53 = vmax.f32 %v2512_v9, 0.0 }
 0x2a9   :  { %v2113_v23 = vpop.f32.mrb[232].mxu1  ;;  %v2387_v4 = vpop.f32.mrb[232].mxu0 }
 0x2aa   :  { %2572 = vst [vmem:[%s5371_s3 + $0x48] sm:$0xff] %v2542_v53  ;;  %v2196_v35 = vadd.f32 %v2113_v23, %v5162_v18  ;;  %v2476_v44 = vadd.f32 %v2387_v4, %v2194_v56  ;;  %v3514_v51 = vpop.f32.mrb[233].mxu1  ;;  %v3572_v19 = vpop.f32.mrb[233].mxu0 }
 0x2ab   :  { %v2116_v40 = vpop.f32.mrb[234].mxu1  ;;  %v2390_v3 = vpop.f32.mrb[234].mxu0 }
 0x2ac   :  { %v2513_v49 = vadd.f32 %v5218_v29, %v2476_v44  ;;  %v2197_v48 = vadd.f32 %v2116_v40, %v5165_v11  ;;  %v2477_v25 = vadd.f32 %v2390_v3, %v2195_v41  ;;  %v3573_v45 = vpop.f32.mrb[235].mxu0  ;;  %v3515_v50 = vpop.f32.mrb[235].mxu1 }
 0x2ae   :  { %v2543_v7 = vmax.f32 %v2513_v49, 0.0  ;;  %v2514_v24 = vadd.f32 %v5218_v29, %v2477_v25 }
 0x2b0   :  { %2573 = vst [vmem:[%s5371_s3 + $0x50] sm:$0xff] %v2543_v7  ;;  %v2544_v18 = vmax.f32 %v2514_v24, 0.0 }
 0x2b1   :  { %v2121_v2 = vpop.f32.mrb[236].mxu1  ;;  %v2395_v27 = vpop.f32.mrb[236].mxu0 }
 0x2b2   :  { %2574 = vst [vmem:[%s5371_s3 + $0x58] sm:$0xff] %v2544_v18  ;;  %v2198_v17 = vadd.f32 %v2121_v2, %v5168_v63  ;;  %v2478_v11 = vadd.f32 %v2395_v27, %v2196_v35  ;;  %v3518_v46 = vpop.f32.mrb[237].mxu1  ;;  %v3576_v0 = vpop.f32.mrb[237].mxu0 }
 0x2b3   :  { %v2124_v38 = vpop.f32.mrb[238].mxu1  ;;  %v2398_v26 = vpop.f32.mrb[238].mxu0 }
 0x2b4   :  { %v2515_v52 = vadd.f32 %v5218_v29, %v2478_v11  ;;  %v2199_v60 = vadd.f32 %v2124_v38, %v5171_v54  ;;  %v2479_v22 = vadd.f32 %v2398_v26, %v2197_v48  ;;  %v3577_v57 = vpop.f32.mrb[239].mxu0  ;;  %v3519_v16 = vpop.f32.mrb[239].mxu1 }
 0x2b6   :  { %v2545_v21 = vmax.f32 %v2515_v52, 0.0  ;;  %v2516_v39 = vadd.f32 %v5218_v29, %v2479_v22 }
 0x2b8   :  { %2575 = vst [vmem:[%s5371_s3 + $0x60] sm:$0xff] %v2545_v21  ;;  %v2546_v63 = vmax.f32 %v2516_v39, 0.0 }
 0x2b9   :  { %v2129_v15 = vpop.f32.mrb[240].mxu1  ;;  %v2403_v5 = vpop.f32.mrb[240].mxu0 }
 0x2ba   :  { %2576 = vst [vmem:[%s5371_s3 + $0x68] sm:$0xff] %v2546_v63  ;;  %v2200_v56 = vadd.f32 %v2129_v15, %v5174_v10  ;;  %v2480_v54 = vadd.f32 %v2403_v5, %v2198_v17  ;;  %v3522_v62 = vpop.f32.mrb[241].mxu1  ;;  %v3580_v13 = vpop.f32.mrb[241].mxu0 }
 0x2bb   :  { %v2132_v14 = vpop.f32.mrb[242].mxu1  ;;  %v2406_v1 = vpop.f32.mrb[242].mxu0 }
 0x2bc   :  { %v2517_v28 = vadd.f32 %v5218_v29, %v2480_v54  ;;  %v2201_v20 = vadd.f32 %v2132_v14, %v5177_v32  ;;  %v2481_v41 = vadd.f32 %v2406_v1, %v2199_v60  ;;  %v3581_v43 = vpop.f32.mrb[243].mxu0  ;;  %v3523_v30 = vpop.f32.mrb[243].mxu1 }
 0x2be   :  { %v2547_v12 = vmax.f32 %v2517_v28, 0.0  ;;  %v2518_v33 = vadd.f32 %v5218_v29, %v2481_v41 }
 0x2c0   :  { %2577 = vst [vmem:[%s5371_s3 + $0x70] sm:$0xff] %v2547_v12  ;;  %v2548_v10 = vmax.f32 %v2518_v33, 0.0 }
 0x2c1   :  { %v2137_v9 = vpop.f32.mrb[244].mxu1  ;;  %v2411_v53 = vpop.f32.mrb[244].mxu0 }
 0x2c2   :  { %2578 = vst [vmem:[%s5371_s3 + $0x78] sm:$0xff] %v2548_v10  ;;  %v2202_v23 = vadd.f32 %v2137_v9, %v5180_v31  ;;  %v2482_v32 = vadd.f32 %v2411_v53, %v2200_v56  ;;  %v3526_v4 = vpop.f32.mrb[245].mxu1  ;;  %v3584_v35 = vpop.f32.mrb[245].mxu0 }
 0x2c3   :  { %v2140_v44 = vpop.f32.mrb[246].mxu1  ;;  %v2414_v51 = vpop.f32.mrb[246].mxu0 }
 0x2c4   :  { %v2519_v19 = vadd.f32 %v5218_v29, %v2482_v32  ;;  %v2203_v40 = vadd.f32 %v2140_v44, %v5183_v6  ;;  %v2483_v3 = vadd.f32 %v2414_v51, %v2201_v20  ;;  %v3585_v49 = vpop.f32.mrb[247].mxu0  ;;  %v3527_v48 = vpop.f32.mrb[247].mxu1 }
 0x2c6   :  { %v2549_v25 = vmax.f32 %v2519_v19, 0.0  ;;  %v2520_v45 = vadd.f32 %v5218_v29, %v2483_v3 }
 0x2c8   :  { %2579 = vst [vmem:[%s5371_s3 + $0x80] sm:$0xff] %v2549_v25  ;;  %v2550_v31 = vmax.f32 %v2520_v45, 0.0 }
 0x2c9   :  { %v2145_v50 = vpop.f32.mrb[248].mxu1  ;;  %v2419_v7 = vpop.f32.mrb[248].mxu0 }
 0x2ca   :  { %2580 = vst [vmem:[%s5371_s3 + $0x88] sm:$0xff] %v2550_v31  ;;  %v2204_v24 = vadd.f32 %v2145_v50, %v5186_v58  ;;  %v2484_v6 = vadd.f32 %v2419_v7, %v2202_v23  ;;  %v3530_v18 = vpop.f32.mrb[249].mxu1  ;;  %v3588_v2 = vpop.f32.mrb[249].mxu0 }
 0x2cb   :  { %v2148_v27 = vpop.f32.mrb[250].mxu1  ;;  %v2422_v17 = vpop.f32.mrb[250].mxu0 }
 0x2cc   :  { %v2521_v11 = vadd.f32 %v5218_v29, %v2484_v6  ;;  %v2205_v46 = vadd.f32 %v2148_v27, %v5189_v37  ;;  %v2485_v0 = vadd.f32 %v2422_v17, %v2203_v40  ;;  %v3589_v38 = vpop.f32.mrb[251].mxu0  ;;  %v3531_v26 = vpop.f32.mrb[251].mxu1 }
 0x2ce   :  { %v2551_v52 = vmax.f32 %v2521_v11, 0.0  ;;  %v2522_v60 = vadd.f32 %v5218_v29, %v2485_v0 }
 0x2d0   :  { %2581 = vst [vmem:[%s5371_s3 + $0x90] sm:$0xff] %v2551_v52  ;;  %v2552_v58 = vmax.f32 %v2522_v60, 0.0 }
 0x2d1   :  { %v2153_v22 = vpop.f32.mrb[252].mxu1  ;;  %v2427_v57 = vpop.f32.mrb[252].mxu0 }
 0x2d2   :  { %2582 = vst [vmem:[%s5371_s3 + $0x98] sm:$0xff] %v2552_v58  ;;  %v2206_v16 = vadd.f32 %v2153_v22, %v5192_v34  ;;  %v2486_v37 = vadd.f32 %v2427_v57, %v2204_v24  ;;  %v3534_v21 = vpop.f32.mrb[253].mxu1  ;;  %v3592_v39 = vpop.f32.mrb[253].mxu0 }
 0x2d3   :  { %v2156_v63 = vpop.f32.mrb[254].mxu1  ;;  %v2430_v15 = vpop.f32.mrb[254].mxu0 }
 0x2d4   :  { %v2523_v5 = vadd.f32 %v5218_v29, %v2486_v37  ;;  %v2207_v56 = vadd.f32 %v2156_v63, %v5195_v8  ;;  %v2487_v54 = vadd.f32 %v2430_v15, %v2205_v46  ;;  %v3593_v62 = vpop.f32.mrb[255].mxu0  ;;  %v3535_v13 = vpop.f32.mrb[255].mxu1 }
 0x2d6   :  { %v2553_v14 = vmax.f32 %v2523_v5, 0.0  ;;  %v2524_v1 = vadd.f32 %v5218_v29, %v2487_v54 }
 0x2d8   :  { %2583 = vst [vmem:[%s5371_s3 + $0xa0] sm:$0xff] %v2553_v14  ;;  %v2554_v34 = vmax.f32 %v2524_v1, 0.0 }
 0x2d9   :  { %v2161_v28 = vpop.f32.mrb[0].mxu1  ;;  %v2435_v20 = vpop.f32.mrb[0].mxu0 }
 0x2da   :  { %2584 = vst [vmem:[%s5371_s3 + $0xa8] sm:$0xff] %v2554_v34  ;;  %v2208_v41 = vadd.f32 %v2161_v28, %v5198_v42  ;;  %v2488_v8 = vadd.f32 %v2435_v20, %v2206_v16  ;;  %v3538_v43 = vpop.f32.mrb[1].mxu1  ;;  %v3596_v30 = vpop.f32.mrb[1].mxu0 }
 0x2db   :  { %v2164_v12 = vpop.f32.mrb[2].mxu1  ;;  %v2438_v33 = vpop.f32.mrb[2].mxu0 }
 0x2dc   :  { %v2525_v10 = vadd.f32 %v5218_v29, %v2488_v8  ;;  %v2209_v9 = vadd.f32 %v2164_v12, %v5201_v36  ;;  %v2489_v53 = vadd.f32 %v2438_v33, %v2207_v56  ;;  %v3597_v23 = vpop.f32.mrb[3].mxu0  ;;  %v3539_v32 = vpop.f32.mrb[3].mxu1 }
 0x2de   :  { %v2555_v4 = vmax.f32 %v2525_v10, 0.0  ;;  %v2526_v35 = vadd.f32 %v5218_v29, %v2489_v53 }
 0x2e0   :  { %2585 = vst [vmem:[%s5371_s3 + $0xb0] sm:$0xff] %v2555_v4  ;;  %v2556_v42 = vmax.f32 %v2526_v35, 0.0 }
 0x2e1   :  { %v2169_v44 = vpop.f32.mrb[4].mxu1  ;;  %v2443_v51 = vpop.f32.mrb[4].mxu0 }
 0x2e2   :  { %2586 = vst [vmem:[%s5371_s3 + $0xb8] sm:$0xff] %v2556_v42  ;;  %v2210_v19 = vadd.f32 %v2169_v44, %v5204_v59  ;;  %v2490_v36 = vadd.f32 %v2443_v51, %v2208_v41  ;;  %v3542_v40 = vpop.f32.mrb[5].mxu1  ;;  %v3600_v3 = vpop.f32.mrb[5].mxu0 }
 0x2e3   :  { %v2172_v49 = vpop.f32.mrb[6].mxu1  ;;  %v2446_v48 = vpop.f32.mrb[6].mxu0 }
 0x2e4   :  { %v2527_v25 = vadd.f32 %v5218_v29, %v2490_v36  ;;  %v2211_v45 = vadd.f32 %v2172_v49, %v5207_v61  ;;  %v2491_v31 = vadd.f32 %v2446_v48, %v2209_v9  ;;  %v3601_v50 = vpop.f32.mrb[7].mxu0  ;;  %v3543_v7 = vpop.f32.mrb[7].mxu1 }
 0x2e6   :  { %v2557_v24 = vmax.f32 %v2527_v25, 0.0  ;;  %v2528_v6 = vadd.f32 %v5218_v29, %v2491_v31 }
 0x2e8   :  { %2587 = vst [vmem:[%s5371_s3 + $0xc0] sm:$0xff] %v2557_v24  ;;  %v2558_v59 = vmax.f32 %v2528_v6, 0.0 }
 0x2e9   :  { %v2177_v18 = vpop.f32.mrb[8].mxu1  ;;  %v2451_v2 = vpop.f32.mrb[8].mxu0 }
 0x2ea   :  { %2588 = vst [vmem:[%s5371_s3 + $0xc8] sm:$0xff] %v2558_v59  ;;  %v2212_v27 = vadd.f32 %v2177_v18, %v5209_v47  ;;  %v2492_v61 = vadd.f32 %v2451_v2, %v2210_v19  ;;  %v3546_v17 = vpop.f32.mrb[9].mxu1  ;;  %v3604_v11 = vpop.f32.mrb[9].mxu0 }
 0x2eb   :  { %v2180_v46 = vpop.f32.mrb[10].mxu1  ;;  %v2454_v0 = vpop.f32.mrb[10].mxu0 }
 0x2ec   :  { %v2529_v38 = vadd.f32 %v5218_v29, %v2492_v61  ;;  %v2213_v26 = vadd.f32 %v2180_v46, %v5212_v55  ;;  %v2493_v52 = vadd.f32 %v2454_v0, %v2211_v45  ;;  %v3605_v60 = vpop.f32.mrb[11].mxu0  ;;  %v3547_v58 = vpop.f32.mrb[11].mxu1 }
 0x2ee   :  { %v2559_v22 = vmax.f32 %v2529_v38, 0.0  ;;  %v2530_v57 = vadd.f32 %v5218_v29, %v2493_v52 }
 0x2f0   :  { %2589 = vst [vmem:[%s5371_s3 + $0xd0] sm:$0xff] %v2559_v22  ;;  %v2560_v47 = vmax.f32 %v2530_v57, 0.0 }
 0x2f1   :  { %v2459_v16 = vpop.f32.mrb[12].mxu0 }
 0x2f2   :  { %2590 = vst [vmem:[%s5371_s3 + $0xd8] sm:$0xff] %v2560_v47  ;;  %v2494_v37 = vadd.f32 %v2459_v16, %v2212_v27  ;;  %v3608_v21 = vpop.f32.mrb[13].mxu0 }
 0x2f3   :  { %v2462_v39 = vpop.f32.mrb[14].mxu0 }
 0x2f4   :  { %v2531_v55 = vadd.f32 %v5218_v29, %v2494_v37  ;;  %v2495_v63 = vadd.f32 %v2462_v39, %v2213_v26  ;;  %v3609_v15 = vpop.f32.mrb[15].mxu0 }
 0x2f6   :  { %v2561_v5 = vmax.f32 %v2531_v55, 0.0  ;;  %v2532_v56 = vadd.f32 %v5218_v29, %v2495_v63 }
 0x2f8   :  { %2591 = vst [vmem:[%s5371_s3 + $0xe0] sm:$0xff] %v2561_v5  ;;  %v2562_v54 = vmax.f32 %v2532_v56, 0.0 }
 0x2fa   :  { %2592 = vst [vmem:[%s5371_s3 + $0xe8] sm:$0xff] %v2562_v54 }

</bundles_post_ra>
